<compile_context>
chip_gen: v7x
topology: tpu7x:2x2x1
jax: 0.10.0
libtpu: 0.0.40
codegen_flags: <defaults>
</compile_context>

<pallas_src>
import functools
import math

import jax
import jax.numpy as jnp
from jax.experimental import pallas as pl
from jax.experimental.pallas import tpu as pltpu

LN_EPS = 1e-6


# ---------------------------------------------------------------------------
# Per-generation VMEM budget / tile selection
# ---------------------------------------------------------------------------

@functools.lru_cache(maxsize=None)
def _vmem_limit_bytes():
    cap = None
    try:
        cap = getattr(pltpu.get_tpu_info(), "vmem_capacity_bytes", None)
    except Exception:
        cap = None
    if not cap:
        cap = 64 * 1024 * 1024          # v7x-safe assumption when query fails
    return int(cap) * 3 // 4            # leave headroom for vregs / compiler scratch


def _q_tile(seq_len):
    """Query-tile size for the attention grid (multiple of 8, or the full sequence)."""
    if seq_len <= 256:
        return seq_len
    for t in (256, 128, 64, 32, 16, 8):
        if seq_len % t == 0:
            return t
    return seq_len


def _row_tile(rows, d_model, d_ff):
    """FFN row tile: largest candidate whose working set fits the per-generation budget."""
    budget = _vmem_limit_bytes()
    # two bf16 weight slabs, double-buffered by the pipeline
    weight_bytes = 2 * 2 * (d_model * d_ff * 2)
    cands = [t for t in (1024, 512, 256, 128, 64, 32, 16, 8)
             if rows % t == 0 and rows // t >= 2] or [rows]
    for t in cands:
        act_bytes = 2 * 2 * t * d_model * 4 + t * d_ff * 4   # in/out tiles (dbl-buf) + hidden
        if weight_bytes + act_bytes <= budget // 2:
            return t
    return cands[-1]


# ---------------------------------------------------------------------------
# In-kernel helpers
# ---------------------------------------------------------------------------

def _layernorm(z, g, b, eps):
    # z: (rows, D) f32; g/b: (1, D) f32
    mu = jnp.mean(z, axis=-1, keepdims=True)
    var = jnp.mean((z - mu) ** 2, axis=-1, keepdims=True)
    return (z - mu) * jax.lax.rsqrt(var + eps) * g + b


def _rep_spec(arr):
    """Whole-array block replicated to every grid step (weights / biases / LN params)."""
    nd = arr.ndim
    return pl.BlockSpec(arr.shape, lambda *g: (0,) * nd)


# ---------------------------------------------------------------------------
# Kernels
# ---------------------------------------------------------------------------

def _attn_block_kernel(xq_ref, kvsrc_ref, wq_ref, bq_ref, wkv_ref, bkv_ref,
                       wo_ref, bo_ref, g_ref, b_ref, o_ref, heads_ref,
                       *, n_heads, causal, eps, q_tile):
    """One query tile of (attention -> out-proj -> residual add -> LayerNorm)."""
    D = xq_ref.shape[-1]
    hd = D // n_heads

    x32 = xq_ref[...].astype(jnp.float32)          # residual, f32
    x16 = xq_ref[...].astype(jnp.bfloat16)         # MXU operand
    kvsrc16 = kvsrc_ref[...].astype(jnp.bfloat16)  # full key/value source (S, D)

    # Q projection for this query tile (1/sqrt(hd) already folded into wq/bq at pack time)
    # and fused (D, 2D) K|V projection for the full key sequence.  bf16 x bf16 -> f32.
    q = jnp.dot(x16, wq_ref[...], preferred_element_type=jnp.float32) + bq_ref[...]
    kv = jnp.dot(kvsrc16, wkv_ref[...], preferred_element_type=jnp.float32) + bkv_ref[...]
    q16 = q.astype(jnp.bfloat16)
    k16 = kv[:, :D].astype(jnp.bfloat16)
    v16 = kv[:, D:].astype(jnp.bfloat16)

    tq = q.shape[0]
    S = kv.shape[0]
    if causal:
        q_start = pl.program_id(1) * q_tile
        row = q_start + jax.lax.broadcasted_iota(jnp.int32, (tq, S), 0)
        col = jax.lax.broadcasted_iota(jnp.int32, (tq, S), 1)
        keep = row >= col                            # 1 = attend, 0 = masked

    # TODO(synk): for long sequences, stream K/V in S-blocks with online softmax and skip
    # fully-masked key blocks in the causal case instead of masking the full (tq, S) scores.
    # TODO(synk): for large n_heads make heads a grid axis / fori_loop to bound live ranges.
    for h in range(n_heads):                         # static unroll, static lane slices
        sl = slice(h * hd, (h + 1) * hd)
        # q_h @ k_h^T via contracting dims (no materialized transpose); f32 scores.
        s = jax.lax.dot_general(q16[:, sl], k16[:, sl], (((1,), (1,)), ((), ())),
                                preferred_element_type=jnp.float32)
        if causal:
            s = jnp.where(keep, s, jnp.float32(-1e9))          # masked_fill(mask == 0, -1e9)
        s = s - jnp.max(s, axis=-1, keepdims=True)             # stable softmax, f32
        p = jnp.exp(s)
        p = p * pl.reciprocal(jnp.sum(p, axis=-1, keepdims=True), approx=True)
        # head output into the (tq, D) f32 scratch at its static lane offset
        heads_ref[:, sl] = jnp.dot(p.astype(jnp.bfloat16), v16[:, sl],
                                   preferred_element_type=jnp.float32)

    # ONE full-D output projection (far better MXU fill than per-head folds).
    proj = jnp.dot(heads_ref[...].astype(jnp.bfloat16), wo_ref[...],
                   preferred_element_type=jnp.float32) + bo_ref[...]
    y = x32 + proj
    o_ref[...] = _layernorm(y, g_ref[...], b_ref[...], eps).astype(o_ref.dtype)


def _ffn_block_kernel(x_ref, w1_ref, b1_ref, w2_ref, b2_ref, g_ref, b_ref, o_ref, *, eps):
    x32 = x_ref[...].astype(jnp.float32)             # residual, f32
    x16 = x_ref[...].astype(jnp.bfloat16)
    h = jnp.dot(x16, w1_ref[...], preferred_element_type=jnp.float32) + b1_ref[...]
    h = jnp.maximum(h, 0.0)                          # ReLU (f32)
    f = jnp.dot(h.astype(jnp.bfloat16), w2_ref[...],
                preferred_element_type=jnp.float32) + b2_ref[...]
    o_ref[...] = _layernorm(x32 + f, g_ref[...], b_ref[...], eps).astype(o_ref.dtype)


# ---------------------------------------------------------------------------
# pallas_call wrappers
# ---------------------------------------------------------------------------

def attn_block(x, kv_src, p, gamma, beta, *, n_heads, causal):
    """Fused attention block.  kv_src == x for masked self-attention, encoder_out for
    cross-attention (ans_mask is all-ones -> masking statically skipped)."""
    B, T, D = x.shape
    S = kv_src.shape[1]
    tq = _q_tile(T)
    nq = T // tq
    # Alias activations in place only when x is NOT also read as the K/V source of later
    # grid steps (i.e. cross-attention); self-attention passes x twice, so no alias.
    aliases = {} if causal else {0: 0}
    return pl.pallas_call(
        functools.partial(_attn_block_kernel, n_heads=n_heads, causal=causal,
                          eps=LN_EPS, q_tile=tq),
        out_shape=jax.ShapeDtypeStruct((B, T, D), x.dtype),
        grid=(B, nq),
        in_specs=[
            pl.BlockSpec((None, tq, D), lambda b, qi: (b, qi, 0)),   # query / residual tile
            pl.BlockSpec((None, S, D), lambda b, qi: (b, 0, 0)),     # full K/V source
            _rep_spec(p["wq_t"]), _rep_spec(p["bq"]),
            _rep_spec(p["wkv_t"]), _rep_spec(p["bkv"]),
            _rep_spec(p["wo_t"]), _rep_spec(p["bo"]),
            _rep_spec(gamma), _rep_spec(beta),
        ],
        out_specs=pl.BlockSpec((None, tq, D), lambda b, qi: (b, qi, 0)),
        scratch_shapes=[pltpu.VMEM((tq, D), jnp.float32)],           # per-head outputs
        input_output_aliases=aliases,
        compiler_params=pltpu.CompilerParams(
            dimension_semantics=("parallel", "parallel"),
            vmem_limit_bytes=_vmem_limit_bytes()),
    )(x, kv_src, p["wq_t"], p["bq"], p["wkv_t"], p["bkv"],
      p["wo_t"], p["bo"], gamma, beta)


def ffn_block(x, p, gamma, beta):
    B, T, D = x.shape
    rows = B * T
    d_ff = p["w1_t"].shape[1]
    x2 = x.reshape(rows, D)
    tm = _row_tile(rows, D, d_ff)
    out = pl.pallas_call(
        functools.partial(_ffn_block_kernel, eps=LN_EPS),
        out_shape=jax.ShapeDtypeStruct((rows, D), x.dtype),
        grid=(rows // tm,),
        in_specs=[
            pl.BlockSpec((tm, D), lambda i: (i, 0)),
            _rep_spec(p["w1_t"]), _rep_spec(p["b1"]),
            _rep_spec(p["w2_t"]), _rep_spec(p["b2"]),
            _rep_spec(gamma), _rep_spec(beta),
        ],
        out_specs=pl.BlockSpec((tm, D), lambda i: (i, 0)),
        input_output_aliases={0: 0},
        compiler_params=pltpu.CompilerParams(
            dimension_semantics=("parallel",),
            vmem_limit_bytes=_vmem_limit_bytes()),
    )(x2, p["w1_t"], p["b1"], p["w2_t"], p["b2"], gamma, beta)
    return out.reshape(B, T, D)


def transformer_decoder(params, x, encoder_out, n_heads):
    # input_mask = causal (generated with iota inside the self-attention kernel)
    # ans_mask   = all-ones (masking statically skipped in the cross-attention kernel)
    # TODO(synk): arbitrary runtime mask tensors would need an extra mask input ref.
    out_dtype = x.dtype
    xb = x.astype(jnp.bfloat16)                      # bf16 activations across blocks
    eb = encoder_out.astype(jnp.bfloat16)
    xb = attn_block(xb, xb, params["masked_attn"], params["ln1_g"], params["ln1_b"],
                    n_heads=n_heads, causal=True)
    xb = attn_block(xb, eb, params["enc_attn"], params["ln2_g"], params["ln2_b"],
                    n_heads=n_heads, causal=False)
    xb = ffn_block(xb, params["ffw"], params["ln3_g"], params["ln3_b"])
    return xb.astype(out_dtype)


# ---------------------------------------------------------------------------
# Deterministic parameter initialization (torch layout) + one-time repack
# ---------------------------------------------------------------------------

def init_torch_style_params(key, d_model, d_ff):
    """Parameters in PyTorch nn.Linear layout: weight (D_out, D_in), bias (D_out,)."""
    def lin(k, dout, din):
        kw, kb = jax.random.split(k)
        s = 0.02
        return (s * jax.random.normal(kw, (dout, din), jnp.float32),
                s * jax.random.normal(kb, (dout,), jnp.float32))

    def mha(k):
        ks = jax.random.split(k, 4)
        wq, bq = lin(ks[0], d_model, d_model)
        wk, bk = lin(ks[1], d_model, d_model)
        wv, bv = lin(ks[2], d_model, d_model)
        wo, bo = lin(ks[3], d_model, d_model)
        return {"wq": wq, "bq": bq, "wk": wk, "bk": bk,
                "wv": wv, "bv": bv, "wo": wo, "bo": bo}

    k1, k2, k3, k4 = jax.random.split(key, 4)
    w1, b1 = lin(k3, d_ff, d_model)
    w2, b2 = lin(k4, d_model, d_ff)
    ones = jnp.ones((d_model,), jnp.float32)
    zeros = jnp.zeros((d_model,), jnp.float32)
    return {
        "masked_attn": mha(k1), "enc_attn": mha(k2),
        "ffw_w1": w1, "ffw_b1": b1, "ffw_w2": w2, "ffw_b2": b2,
        "ln1_g": ones, "ln1_b": zeros,
        "ln2_g": ones, "ln2_b": zeros,
        "ln3_g": ones, "ln3_b": zeros,
    }


def pack_params(tp, n_heads, weight_dtype=jnp.bfloat16):
    """One-time repack (outside the hot path): transpose to (D_in, D_out), fuse K|V weights,
    fold the 1/sqrt(head_dim) attention scale into the Q weight/bias, cast weights to bf16,
    and keep biases / LN params as (1, D) f32."""
    d_model = tp["ln1_g"].shape[0]
    assert d_model % n_heads == 0, "d_model must be divisible by n_heads"
    scale = 1.0 / math.sqrt(d_model // n_heads)

    def attn(a):
        return {
            "wq_t": (a["wq"].T * scale).astype(weight_dtype),                        # (D, D)
            "bq": (a["bq"] * scale)[None, :].astype(jnp.float32),                    # (1, D)
            "wkv_t": jnp.concatenate([a["wk"].T, a["wv"].T], axis=1).astype(weight_dtype),  # (D, 2D)
            "bkv": jnp.concatenate([a["bk"], a["bv"]])[None, :].astype(jnp.float32),        # (1, 2D)
            "wo_t": a["wo"].T.astype(weight_dtype),
            "bo": a["bo"][None, :].astype(jnp.float32),
        }

    packed = {
        "masked_attn": attn(tp["masked_attn"]),
        "enc_attn": attn(tp["enc_attn"]),
        "ffw": {
            "w1_t": tp["ffw_w1"].T.astype(weight_dtype), "b1": tp["ffw_b1"][None, :],
            "w2_t": tp["ffw_w2"].T.astype(weight_dtype), "b2": tp["ffw_b2"][None, :],
        },
    }
    for n in ("ln1", "ln2", "ln3"):
        packed[n + "_g"] = tp[n + "_g"][None, :].astype(jnp.float32)
        packed[n + "_b"] = tp[n + "_b"][None, :].astype(jnp.float32)
    return packed


# ---------------------------------------------------------------------------
# Main
# ---------------------------------------------------------------------------

if __name__ == "__main__":
    # Small but lane-aligned config: d_model / d_ff multiples of 128 so every output store
    # is lane-dense and per-head slices are static lane sub-ranges.
    B, T, S = 2, 16, 16          # batch, decoder seq len, encoder seq len
    d_model, n_head, d_ff = 128, 4, 256

    key = jax.random.PRNGKey(0)
    kp, kx, ke = jax.random.split(key, 3)

    torch_params = init_torch_style_params(kp, d_model, d_ff)
    params = pack_params(torch_params, n_head)   # one-time weight repack, bf16 datapath

    x = jax.random.normal(kx, (B, T, d_model), jnp.float32)
    encoder_out = jax.random.normal(ke, (B, S, d_model), jnp.float32)

    fwd = jax.jit(functools.partial(transformer_decoder, n_heads=n_head))
    out = fwd(params, x, encoder_out)
    out = jax.block_until_ready(out)
    assert out.shape == (B, T, d_model) and out.dtype == jnp.float32
    print("KERNEL_OK")
</pallas_src>

<mosaic_0001>
module attributes {stable_mosaic.version = 11 : i64} {
  func.func @_attn_block_kernel(%arg0: i32, %arg1: i32, %arg2: memref<1x16x128xbf16, #tpu.memory_space<vmem>>, %arg3: memref<1x16x128xbf16, #tpu.memory_space<vmem>>, %arg4: memref<128x128xbf16, #tpu.memory_space<vmem>>, %arg5: memref<1x128xf32, #tpu.memory_space<vmem>>, %arg6: memref<128x256xbf16, #tpu.memory_space<vmem>>, %arg7: memref<1x256xf32, #tpu.memory_space<vmem>>, %arg8: memref<128x128xbf16, #tpu.memory_space<vmem>>, %arg9: memref<1x128xf32, #tpu.memory_space<vmem>>, %arg10: memref<1x128xf32, #tpu.memory_space<vmem>>, %arg11: memref<1x128xf32, #tpu.memory_space<vmem>>, %arg12: memref<1x16x128xbf16, #tpu.memory_space<vmem>>, %arg13: memref<16x128xf32, #tpu.memory_space<vmem>>) attributes {dimension_semantics = [#tpu.dimension_semantics<parallel>, #tpu.dimension_semantics<parallel>], iteration_bounds = array<i64: 2, 1>, scalar_prefetch = 0 : i64, scratch_operands = 1 : i64, tpu.core_type = #tpu.core_type<tc>, window_params = [{transform_indices = @transform_0, window_bounds = array<i64: 1, 16, 128>}, {transform_indices = @transform_1, window_bounds = array<i64: 1, 16, 128>}, {pipeline_mode = #tpu.pipeline_mode<synchronous>, transform_indices = @transform_2, window_bounds = array<i64: 128, 128>}, {pipeline_mode = #tpu.pipeline_mode<synchronous>, transform_indices = @transform_3, window_bounds = array<i64: 1, 128>}, {pipeline_mode = #tpu.pipeline_mode<synchronous>, transform_indices = @transform_4, window_bounds = array<i64: 128, 256>}, {pipeline_mode = #tpu.pipeline_mode<synchronous>, transform_indices = @transform_5, window_bounds = array<i64: 1, 256>}, {pipeline_mode = #tpu.pipeline_mode<synchronous>, transform_indices = @transform_6, window_bounds = array<i64: 128, 128>}, {pipeline_mode = #tpu.pipeline_mode<synchronous>, transform_indices = @transform_7, window_bounds = array<i64: 1, 128>}, {pipeline_mode = #tpu.pipeline_mode<synchronous>, transform_indices = @transform_8, window_bounds = array<i64: 1, 128>}, {pipeline_mode = #tpu.pipeline_mode<synchronous>, transform_indices = @transform_9, window_bounds = array<i64: 1, 128>}, {transform_indices = @transform_10, window_bounds = array<i64: 1, 16, 128>}]} {
    %c0 = arith.constant 0 : index
    %c0_0 = arith.constant 0 : index
    %c0_1 = arith.constant 0 : index
    %0 = vector.load %arg2[%c0, %c0_0, %c0_1] : memref<1x16x128xbf16, #tpu.memory_space<vmem>>, vector<1x16x128xbf16>
    %1 = vector.shape_cast %0 : vector<1x16x128xbf16> to vector<16x128xbf16>
    %2 = arith.extf %1 : vector<16x128xbf16> to vector<16x128xf32>
    %c0_2 = arith.constant 0 : index
    %c0_3 = arith.constant 0 : index
    %c0_4 = arith.constant 0 : index
    %3 = vector.load %arg2[%c0_2, %c0_3, %c0_4] : memref<1x16x128xbf16, #tpu.memory_space<vmem>>, vector<1x16x128xbf16>
    %4 = vector.shape_cast %3 : vector<1x16x128xbf16> to vector<16x128xbf16>
    %c0_5 = arith.constant 0 : index
    %c0_6 = arith.constant 0 : index
    %c0_7 = arith.constant 0 : index
    %5 = vector.load %arg3[%c0_5, %c0_6, %c0_7] : memref<1x16x128xbf16, #tpu.memory_space<vmem>>, vector<1x16x128xbf16>
    %6 = vector.shape_cast %5 : vector<1x16x128xbf16> to vector<16x128xbf16>
    %c0_8 = arith.constant 0 : index
    %c0_9 = arith.constant 0 : index
    %7 = vector.load %arg4[%c0_8, %c0_9] : memref<128x128xbf16, #tpu.memory_space<vmem>>, vector<128x128xbf16>
    %cst = arith.constant dense<0.000000e+00> : vector<16x128xf32>
    %8 = tpu.matmul %4, %7, %cst {dimension_numbers = #tpu.dot_dimension_numbers<[1], [0], [0], [1], [0, 0, 1, 1], [], []>} : vector<16x128xbf16>, vector<128x128xbf16>, vector<16x128xf32> -> vector<16x128xf32>
    %c0_10 = arith.constant 0 : index
    %c0_11 = arith.constant 0 : index
    %9 = vector.load %arg5[%c0_10, %c0_11] : memref<1x128xf32, #tpu.memory_space<vmem>>, vector<1x128xf32>
    %10 = vector.broadcast %9 : vector<1x128xf32> to vector<16x128xf32>
    %11 = arith.addf %8, %10 : vector<16x128xf32>
    %c0_12 = arith.constant 0 : index
    %c0_13 = arith.constant 0 : index
    %12 = vector.load %arg6[%c0_12, %c0_13] : memref<128x256xbf16, #tpu.memory_space<vmem>>, vector<128x256xbf16>
    %cst_14 = arith.constant dense<0.000000e+00> : vector<16x256xf32>
    %13 = tpu.matmul %6, %12, %cst_14 {dimension_numbers = #tpu.dot_dimension_numbers<[1], [0], [0], [1], [0, 0, 1, 1], [], []>} : vector<16x128xbf16>, vector<128x256xbf16>, vector<16x256xf32> -> vector<16x256xf32>
    %c0_15 = arith.constant 0 : index
    %c0_16 = arith.constant 0 : index
    %14 = vector.load %arg7[%c0_15, %c0_16] : memref<1x256xf32, #tpu.memory_space<vmem>>, vector<1x256xf32>
    %15 = vector.broadcast %14 : vector<1x256xf32> to vector<16x256xf32>
    %16 = arith.addf %13, %15 : vector<16x256xf32>
    %17 = arith.truncf %11 : vector<16x128xf32> to vector<16x128xbf16>
    %18 = vector.extract_strided_slice %16 {offsets = [0, 0], sizes = [16, 128], strides = [1, 1]} : vector<16x256xf32> to vector<16x128xf32>
    %19 = arith.truncf %18 : vector<16x128xf32> to vector<16x128xbf16>
    %20 = vector.extract_strided_slice %16 {offsets = [0, 128], sizes = [16, 128], strides = [1, 1]} : vector<16x256xf32> to vector<16x128xf32>
    %21 = arith.truncf %20 : vector<16x128xf32> to vector<16x128xbf16>
    %c16_i32 = arith.constant 16 : i32
    %22 = arith.muli %arg1, %c16_i32 : i32
    %23 = tpu.iota {dimensions = array<i32: 0>} : vector<16x16xi32>
    %24 = vector.broadcast %22 : i32 to vector<16x16xi32>
    %25 = arith.addi %24, %23 : vector<16x16xi32>
    %26 = tpu.iota {dimensions = array<i32: 1>} : vector<16x16xi32>
    %27 = arith.cmpi sge, %25, %26 : vector<16x16xi32>
    %28 = vector.extract_strided_slice %17 {offsets = [0, 0], sizes = [16, 32], strides = [1, 1]} : vector<16x128xbf16> to vector<16x32xbf16>
    %29 = vector.extract_strided_slice %19 {offsets = [0, 0], sizes = [16, 32], strides = [1, 1]} : vector<16x128xbf16> to vector<16x32xbf16>
    %cst_17 = arith.constant dense<0.000000e+00> : vector<16x16xf32>
    %30 = tpu.matmul %28, %29, %cst_17 {dimension_numbers = #tpu.dot_dimension_numbers<[1], [1], [0], [0], [0, 0, 1, 0], [], []>} : vector<16x32xbf16>, vector<16x32xbf16>, vector<16x16xf32> -> vector<16x16xf32>
    %cst_18 = arith.constant -1.000000e+09 : f32
    %31 = vector.broadcast %cst_18 : f32 to vector<16x16xf32>
    %32 = arith.select %27, %30, %31 : vector<16x16xi1>, vector<16x16xf32>
    %cst_19 = arith.constant dense<0xFF800000> : vector<16xf32>
    %33 = vector.multi_reduction <maximumf>, %32, %cst_19 [1] : vector<16x16xf32> to vector<16xf32>
    %34 = vector.shape_cast %33 : vector<16xf32> to vector<16x1xf32>
    %35 = vector.broadcast %34 : vector<16x1xf32> to vector<16x16xf32>
    %36 = arith.subf %32, %35 : vector<16x16xf32>
    %37 = math.exp %36 : vector<16x16xf32>
    %cst_20 = arith.constant dense<0.000000e+00> : vector<16xf32>
    %38 = vector.multi_reduction <add>, %37, %cst_20 [1] : vector<16x16xf32> to vector<16xf32>
    %39 = vector.shape_cast %38 : vector<16xf32> to vector<16x1xf32>
    %40 = tpu.reciprocal %39 {approx = true} : vector<16x1xf32> -> vector<16x1xf32>
    %41 = vector.broadcast %40 : vector<16x1xf32> to vector<16x16xf32>
    %42 = arith.mulf %37, %41 : vector<16x16xf32>
    %43 = arith.truncf %42 : vector<16x16xf32> to vector<16x16xbf16>
    %44 = vector.extract_strided_slice %21 {offsets = [0, 0], sizes = [16, 32], strides = [1, 1]} : vector<16x128xbf16> to vector<16x32xbf16>
    %cst_21 = arith.constant dense<0.000000e+00> : vector<16x32xf32>
    %45 = tpu.matmul %43, %44, %cst_21 {dimension_numbers = #tpu.dot_dimension_numbers<[1], [0], [0], [1], [0, 0, 1, 1], [], []>} : vector<16x16xbf16>, vector<16x32xbf16>, vector<16x32xf32> -> vector<16x32xf32>
    %c0_22 = arith.constant 0 : index
    %c0_23 = arith.constant 0 : index
    %46 = vector.load %arg13[%c0_22, %c0_23] : memref<16x128xf32, #tpu.memory_space<vmem>>, vector<16x32xf32>
    tpu.vector_store %arg13[%c0_22, %c0_23], %45 {strides = array<i32>} : memref<16x128xf32, #tpu.memory_space<vmem>>, vector<16x32xf32>,
    %47 = vector.extract_strided_slice %17 {offsets = [0, 32], sizes = [16, 32], strides = [1, 1]} : vector<16x128xbf16> to vector<16x32xbf16>
    %48 = vector.extract_strided_slice %19 {offsets = [0, 32], sizes = [16, 32], strides = [1, 1]} : vector<16x128xbf16> to vector<16x32xbf16>
    %cst_24 = arith.constant dense<0.000000e+00> : vector<16x16xf32>
    %49 = tpu.matmul %47, %48, %cst_24 {dimension_numbers = #tpu.dot_dimension_numbers<[1], [1], [0], [0], [0, 0, 1, 0], [], []>} : vector<16x32xbf16>, vector<16x32xbf16>, vector<16x16xf32> -> vector<16x16xf32>
    %cst_25 = arith.constant -1.000000e+09 : f32
    %50 = vector.broadcast %cst_25 : f32 to vector<16x16xf32>
    %51 = arith.select %27, %49, %50 : vector<16x16xi1>, vector<16x16xf32>
    %cst_26 = arith.constant dense<0xFF800000> : vector<16xf32>
    %52 = vector.multi_reduction <maximumf>, %51, %cst_26 [1] : vector<16x16xf32> to vector<16xf32>
    %53 = vector.shape_cast %52 : vector<16xf32> to vector<16x1xf32>
    %54 = vector.broadcast %53 : vector<16x1xf32> to vector<16x16xf32>
    %55 = arith.subf %51, %54 : vector<16x16xf32>
    %56 = math.exp %55 : vector<16x16xf32>
    %cst_27 = arith.constant dense<0.000000e+00> : vector<16xf32>
    %57 = vector.multi_reduction <add>, %56, %cst_27 [1] : vector<16x16xf32> to vector<16xf32>
    %58 = vector.shape_cast %57 : vector<16xf32> to vector<16x1xf32>
    %59 = tpu.reciprocal %58 {approx = true} : vector<16x1xf32> -> vector<16x1xf32>
    %60 = vector.broadcast %59 : vector<16x1xf32> to vector<16x16xf32>
    %61 = arith.mulf %56, %60 : vector<16x16xf32>
    %62 = arith.truncf %61 : vector<16x16xf32> to vector<16x16xbf16>
    %63 = vector.extract_strided_slice %21 {offsets = [0, 32], sizes = [16, 32], strides = [1, 1]} : vector<16x128xbf16> to vector<16x32xbf16>
    %cst_28 = arith.constant dense<0.000000e+00> : vector<16x32xf32>
    %64 = tpu.matmul %62, %63, %cst_28 {dimension_numbers = #tpu.dot_dimension_numbers<[1], [0], [0], [1], [0, 0, 1, 1], [], []>} : vector<16x16xbf16>, vector<16x32xbf16>, vector<16x32xf32> -> vector<16x32xf32>
    %c0_29 = arith.constant 0 : index
    %c32 = arith.constant 32 : index
    %65 = vector.load %arg13[%c0_29, %c32] : memref<16x128xf32, #tpu.memory_space<vmem>>, vector<16x32xf32>
    tpu.vector_store %arg13[%c0_29, %c32], %64 {strides = array<i32>} : memref<16x128xf32, #tpu.memory_space<vmem>>, vector<16x32xf32>,
    %66 = vector.extract_strided_slice %17 {offsets = [0, 64], sizes = [16, 32], strides = [1, 1]} : vector<16x128xbf16> to vector<16x32xbf16>
    %67 = vector.extract_strided_slice %19 {offsets = [0, 64], sizes = [16, 32], strides = [1, 1]} : vector<16x128xbf16> to vector<16x32xbf16>
    %cst_30 = arith.constant dense<0.000000e+00> : vector<16x16xf32>
    %68 = tpu.matmul %66, %67, %cst_30 {dimension_numbers = #tpu.dot_dimension_numbers<[1], [1], [0], [0], [0, 0, 1, 0], [], []>} : vector<16x32xbf16>, vector<16x32xbf16>, vector<16x16xf32> -> vector<16x16xf32>
    %cst_31 = arith.constant -1.000000e+09 : f32
    %69 = vector.broadcast %cst_31 : f32 to vector<16x16xf32>
    %70 = arith.select %27, %68, %69 : vector<16x16xi1>, vector<16x16xf32>
    %cst_32 = arith.constant dense<0xFF800000> : vector<16xf32>
    %71 = vector.multi_reduction <maximumf>, %70, %cst_32 [1] : vector<16x16xf32> to vector<16xf32>
    %72 = vector.shape_cast %71 : vector<16xf32> to vector<16x1xf32>
    %73 = vector.broadcast %72 : vector<16x1xf32> to vector<16x16xf32>
    %74 = arith.subf %70, %73 : vector<16x16xf32>
    %75 = math.exp %74 : vector<16x16xf32>
    %cst_33 = arith.constant dense<0.000000e+00> : vector<16xf32>
    %76 = vector.multi_reduction <add>, %75, %cst_33 [1] : vector<16x16xf32> to vector<16xf32>
    %77 = vector.shape_cast %76 : vector<16xf32> to vector<16x1xf32>
    %78 = tpu.reciprocal %77 {approx = true} : vector<16x1xf32> -> vector<16x1xf32>
    %79 = vector.broadcast %78 : vector<16x1xf32> to vector<16x16xf32>
    %80 = arith.mulf %75, %79 : vector<16x16xf32>
    %81 = arith.truncf %80 : vector<16x16xf32> to vector<16x16xbf16>
    %82 = vector.extract_strided_slice %21 {offsets = [0, 64], sizes = [16, 32], strides = [1, 1]} : vector<16x128xbf16> to vector<16x32xbf16>
    %cst_34 = arith.constant dense<0.000000e+00> : vector<16x32xf32>
    %83 = tpu.matmul %81, %82, %cst_34 {dimension_numbers = #tpu.dot_dimension_numbers<[1], [0], [0], [1], [0, 0, 1, 1], [], []>} : vector<16x16xbf16>, vector<16x32xbf16>, vector<16x32xf32> -> vector<16x32xf32>
    %c0_35 = arith.constant 0 : index
    %c64 = arith.constant 64 : index
    %84 = vector.load %arg13[%c0_35, %c64] : memref<16x128xf32, #tpu.memory_space<vmem>>, vector<16x32xf32>
    tpu.vector_store %arg13[%c0_35, %c64], %83 {strides = array<i32>} : memref<16x128xf32, #tpu.memory_space<vmem>>, vector<16x32xf32>,
    %85 = vector.extract_strided_slice %17 {offsets = [0, 96], sizes = [16, 32], strides = [1, 1]} : vector<16x128xbf16> to vector<16x32xbf16>
    %86 = vector.extract_strided_slice %19 {offsets = [0, 96], sizes = [16, 32], strides = [1, 1]} : vector<16x128xbf16> to vector<16x32xbf16>
    %cst_36 = arith.constant dense<0.000000e+00> : vector<16x16xf32>
    %87 = tpu.matmul %85, %86, %cst_36 {dimension_numbers = #tpu.dot_dimension_numbers<[1], [1], [0], [0], [0, 0, 1, 0], [], []>} : vector<16x32xbf16>, vector<16x32xbf16>, vector<16x16xf32> -> vector<16x16xf32>
    %cst_37 = arith.constant -1.000000e+09 : f32
    %88 = vector.broadcast %cst_37 : f32 to vector<16x16xf32>
    %89 = arith.select %27, %87, %88 : vector<16x16xi1>, vector<16x16xf32>
    %cst_38 = arith.constant dense<0xFF800000> : vector<16xf32>
    %90 = vector.multi_reduction <maximumf>, %89, %cst_38 [1] : vector<16x16xf32> to vector<16xf32>
    %91 = vector.shape_cast %90 : vector<16xf32> to vector<16x1xf32>
    %92 = vector.broadcast %91 : vector<16x1xf32> to vector<16x16xf32>
    %93 = arith.subf %89, %92 : vector<16x16xf32>
    %94 = math.exp %93 : vector<16x16xf32>
    %cst_39 = arith.constant dense<0.000000e+00> : vector<16xf32>
    %95 = vector.multi_reduction <add>, %94, %cst_39 [1] : vector<16x16xf32> to vector<16xf32>
    %96 = vector.shape_cast %95 : vector<16xf32> to vector<16x1xf32>
    %97 = tpu.reciprocal %96 {approx = true} : vector<16x1xf32> -> vector<16x1xf32>
    %98 = vector.broadcast %97 : vector<16x1xf32> to vector<16x16xf32>
    %99 = arith.mulf %94, %98 : vector<16x16xf32>
    %100 = arith.truncf %99 : vector<16x16xf32> to vector<16x16xbf16>
    %101 = vector.extract_strided_slice %21 {offsets = [0, 96], sizes = [16, 32], strides = [1, 1]} : vector<16x128xbf16> to vector<16x32xbf16>
    %cst_40 = arith.constant dense<0.000000e+00> : vector<16x32xf32>
    %102 = tpu.matmul %100, %101, %cst_40 {dimension_numbers = #tpu.dot_dimension_numbers<[1], [0], [0], [1], [0, 0, 1, 1], [], []>} : vector<16x16xbf16>, vector<16x32xbf16>, vector<16x32xf32> -> vector<16x32xf32>
    %c0_41 = arith.constant 0 : index
    %c96 = arith.constant 96 : index
    %103 = vector.load %arg13[%c0_41, %c96] : memref<16x128xf32, #tpu.memory_space<vmem>>, vector<16x32xf32>
    tpu.vector_store %arg13[%c0_41, %c96], %102 {strides = array<i32>} : memref<16x128xf32, #tpu.memory_space<vmem>>, vector<16x32xf32>,
    %c0_42 = arith.constant 0 : index
    %c0_43 = arith.constant 0 : index
    %104 = vector.load %arg13[%c0_42, %c0_43] : memref<16x128xf32, #tpu.memory_space<vmem>>, vector<16x128xf32>
    %105 = arith.truncf %104 : vector<16x128xf32> to vector<16x128xbf16>
    %c0_44 = arith.constant 0 : index
    %c0_45 = arith.constant 0 : index
    %106 = vector.load %arg8[%c0_44, %c0_45] : memref<128x128xbf16, #tpu.memory_space<vmem>>, vector<128x128xbf16>
    %cst_46 = arith.constant dense<0.000000e+00> : vector<16x128xf32>
    %107 = tpu.matmul %105, %106, %cst_46 {dimension_numbers = #tpu.dot_dimension_numbers<[1], [0], [0], [1], [0, 0, 1, 1], [], []>} : vector<16x128xbf16>, vector<128x128xbf16>, vector<16x128xf32> -> vector<16x128xf32>
    %c0_47 = arith.constant 0 : index
    %c0_48 = arith.constant 0 : index
    %108 = vector.load %arg9[%c0_47, %c0_48] : memref<1x128xf32, #tpu.memory_space<vmem>>, vector<1x128xf32>
    %109 = vector.broadcast %108 : vector<1x128xf32> to vector<16x128xf32>
    %110 = arith.addf %107, %109 : vector<16x128xf32>
    %111 = arith.addf %2, %110 : vector<16x128xf32>
    %c0_49 = arith.constant 0 : index
    %c0_50 = arith.constant 0 : index
    %112 = vector.load %arg10[%c0_49, %c0_50] : memref<1x128xf32, #tpu.memory_space<vmem>>, vector<1x128xf32>
    %c0_51 = arith.constant 0 : index
    %c0_52 = arith.constant 0 : index
    %113 = vector.load %arg11[%c0_51, %c0_52] : memref<1x128xf32, #tpu.memory_space<vmem>>, vector<1x128xf32>
    %cst_53 = arith.constant dense<0.000000e+00> : vector<16xf32>
    %114 = vector.multi_reduction <add>, %111, %cst_53 [1] : vector<16x128xf32> to vector<16xf32>
    %115 = vector.shape_cast %114 : vector<16xf32> to vector<16x1xf32>
    %cst_54 = arith.constant 1.280000e+02 : f32
    %116 = vector.broadcast %cst_54 : f32 to vector<16x1xf32>
    %117 = arith.divf %115, %116 : vector<16x1xf32>
    %118 = vector.broadcast %117 : vector<16x1xf32> to vector<16x128xf32>
    %119 = arith.subf %111, %118 : vector<16x128xf32>
    %120 = arith.mulf %119, %119 : vector<16x128xf32>
    %cst_55 = arith.constant dense<0.000000e+00> : vector<16xf32>
    %121 = vector.multi_reduction <add>, %120, %cst_55 [1] : vector<16x128xf32> to vector<16xf32>
    %122 = vector.shape_cast %121 : vector<16xf32> to vector<16x1xf32>
    %cst_56 = arith.constant 1.280000e+02 : f32
    %123 = vector.broadcast %cst_56 : f32 to vector<16x1xf32>
    %124 = arith.divf %122, %123 : vector<16x1xf32>
    %125 = vector.broadcast %117 : vector<16x1xf32> to vector<16x128xf32>
    %126 = arith.subf %111, %125 : vector<16x128xf32>
    %cst_57 = arith.constant 9.99999997E-7 : f32
    %127 = vector.broadcast %cst_57 : f32 to vector<16x1xf32>
    %128 = arith.addf %124, %127 : vector<16x1xf32>
    %129 = math.rsqrt %128 : vector<16x1xf32>
    %130 = vector.broadcast %129 : vector<16x1xf32> to vector<16x128xf32>
    %131 = arith.mulf %126, %130 : vector<16x128xf32>
    %132 = vector.broadcast %112 : vector<1x128xf32> to vector<16x128xf32>
    %133 = arith.mulf %131, %132 : vector<16x128xf32>
    %134 = vector.broadcast %113 : vector<1x128xf32> to vector<16x128xf32>
    %135 = arith.addf %133, %134 : vector<16x128xf32>
    %136 = arith.truncf %135 : vector<16x128xf32> to vector<16x128xbf16>
    %c0_58 = arith.constant 0 : index
    %c0_59 = arith.constant 0 : index
    %c0_60 = arith.constant 0 : index
    %137 = vector.load %arg12[%c0_58, %c0_59, %c0_60] : memref<1x16x128xbf16, #tpu.memory_space<vmem>>, vector<1x16x128xbf16>
    %138 = vector.shape_cast %137 : vector<1x16x128xbf16> to vector<16x128xbf16>
    %139 = vector.shape_cast %136 : vector<16x128xbf16> to vector<1x16x128xbf16>
    tpu.vector_store %arg12[%c0_58, %c0_59, %c0_60], %139 {strides = array<i32>} : memref<1x16x128xbf16, #tpu.memory_space<vmem>>, vector<1x16x128xbf16>,
    return
  }
  func.func @transform_0(%arg0: i32, %arg1: i32) -> (i32, i32, i32) {
    %c0_i32 = arith.constant 0 : i32
    %c0_i32_0 = arith.constant 0 : i32
    return %arg0, %arg1, %c0_i32 : i32, i32, i32
  }
  func.func @transform_1(%arg0: i32, %arg1: i32) -> (i32, i32, i32) {
    %c0_i32 = arith.constant 0 : i32
    %c0_i32_0 = arith.constant 0 : i32
    %c0_i32_1 = arith.constant 0 : i32
    return %arg0, %c0_i32, %c0_i32_0 : i32, i32, i32
  }
  func.func @transform_2(%arg0: i32, %arg1: i32) -> (i32, i32) {
    %c0_i32 = arith.constant 0 : i32
    %c0_i32_0 = arith.constant 0 : i32
    %c0_i32_1 = arith.constant 0 : i32
    return %c0_i32, %c0_i32_0 : i32, i32
  }
  func.func @transform_3(%arg0: i32, %arg1: i32) -> (i32, i32) {
    %c0_i32 = arith.constant 0 : i32
    %c0_i32_0 = arith.constant 0 : i32
    %c0_i32_1 = arith.constant 0 : i32
    return %c0_i32, %c0_i32_0 : i32, i32
  }
  func.func @transform_4(%arg0: i32, %arg1: i32) -> (i32, i32) {
    %c0_i32 = arith.constant 0 : i32
    %c0_i32_0 = arith.constant 0 : i32
    %c0_i32_1 = arith.constant 0 : i32
    return %c0_i32, %c0_i32_0 : i32, i32
  }
  func.func @transform_5(%arg0: i32, %arg1: i32) -> (i32, i32) {
    %c0_i32 = arith.constant 0 : i32
    %c0_i32_0 = arith.constant 0 : i32
    %c0_i32_1 = arith.constant 0 : i32
    return %c0_i32, %c0_i32_0 : i32, i32
  }
  func.func @transform_6(%arg0: i32, %arg1: i32) -> (i32, i32) {
    %c0_i32 = arith.constant 0 : i32
    %c0_i32_0 = arith.constant 0 : i32
    %c0_i32_1 = arith.constant 0 : i32
    return %c0_i32, %c0_i32_0 : i32, i32
  }
  func.func @transform_7(%arg0: i32, %arg1: i32) -> (i32, i32) {
    %c0_i32 = arith.constant 0 : i32
    %c0_i32_0 = arith.constant 0 : i32
    %c0_i32_1 = arith.constant 0 : i32
    return %c0_i32, %c0_i32_0 : i32, i32
  }
  func.func @transform_8(%arg0: i32, %arg1: i32) -> (i32, i32) {
    %c0_i32 = arith.constant 0 : i32
    %c0_i32_0 = arith.constant 0 : i32
    %c0_i32_1 = arith.constant 0 : i32
    return %c0_i32, %c0_i32_0 : i32, i32
  }
  func.func @transform_9(%arg0: i32, %arg1: i32) -> (i32, i32) {
    %c0_i32 = arith.constant 0 : i32
    %c0_i32_0 = arith.constant 0 : i32
    %c0_i32_1 = arith.constant 0 : i32
    return %c0_i32, %c0_i32_0 : i32, i32
  }
  func.func @transform_10(%arg0: i32, %arg1: i32) -> (i32, i32, i32) {
    %c0_i32 = arith.constant 0 : i32
    %c0_i32_0 = arith.constant 0 : i32
    return %arg0, %arg1, %c0_i32 : i32, i32, i32
  }
}

module attributes {stable_mosaic.version = 11 : i64} {
  func.func @_attn_block_kernel(%arg0: i32, %arg1: i32, %arg2: memref<1x16x128xbf16, #tpu.memory_space<vmem>>, %arg3: memref<1x16x128xbf16, #tpu.memory_space<vmem>>, %arg4: memref<128x128xbf16, #tpu.memory_space<vmem>>, %arg5: memref<1x128xf32, #tpu.memory_space<vmem>>, %arg6: memref<128x256xbf16, #tpu.memory_space<vmem>>, %arg7: memref<1x256xf32, #tpu.memory_space<vmem>>, %arg8: memref<128x128xbf16, #tpu.memory_space<vmem>>, %arg9: memref<1x128xf32, #tpu.memory_space<vmem>>, %arg10: memref<1x128xf32, #tpu.memory_space<vmem>>, %arg11: memref<1x128xf32, #tpu.memory_space<vmem>>, %arg12: memref<1x16x128xbf16, #tpu.memory_space<vmem>>, %arg13: memref<16x128xf32, #tpu.memory_space<vmem>>) attributes {dimension_semantics = [#tpu.dimension_semantics<parallel>, #tpu.dimension_semantics<parallel>], iteration_bounds = array<i64: 2, 1>, scalar_prefetch = 0 : i64, scratch_operands = 1 : i64, tpu.core_type = #tpu.core_type<tc>, window_params = [{transform_indices = @transform_0, window_bounds = array<i64: 1, 16, 128>}, {transform_indices = @transform_1, window_bounds = array<i64: 1, 16, 128>}, {pipeline_mode = #tpu.pipeline_mode<synchronous>, transform_indices = @transform_2, window_bounds = array<i64: 128, 128>}, {pipeline_mode = #tpu.pipeline_mode<synchronous>, transform_indices = @transform_3, window_bounds = array<i64: 1, 128>}, {pipeline_mode = #tpu.pipeline_mode<synchronous>, transform_indices = @transform_4, window_bounds = array<i64: 128, 256>}, {pipeline_mode = #tpu.pipeline_mode<synchronous>, transform_indices = @transform_5, window_bounds = array<i64: 1, 256>}, {pipeline_mode = #tpu.pipeline_mode<synchronous>, transform_indices = @transform_6, window_bounds = array<i64: 128, 128>}, {pipeline_mode = #tpu.pipeline_mode<synchronous>, transform_indices = @transform_7, window_bounds = array<i64: 1, 128>}, {pipeline_mode = #tpu.pipeline_mode<synchronous>, transform_indices = @transform_8, window_bounds = array<i64: 1, 128>}, {pipeline_mode = #tpu.pipeline_mode<synchronous>, transform_indices = @transform_9, window_bounds = array<i64: 1, 128>}, {transform_indices = @transform_10, window_bounds = array<i64: 1, 16, 128>}]} {
    %c0 = arith.constant 0 : index
    %c0_0 = arith.constant 0 : index
    %c0_1 = arith.constant 0 : index
    %0 = vector.load %arg2[%c0, %c0_0, %c0_1] : memref<1x16x128xbf16, #tpu.memory_space<vmem>>, vector<1x16x128xbf16>
    %1 = vector.shape_cast %0 : vector<1x16x128xbf16> to vector<16x128xbf16>
    %2 = arith.extf %1 : vector<16x128xbf16> to vector<16x128xf32>
    %c0_2 = arith.constant 0 : index
    %c0_3 = arith.constant 0 : index
    %c0_4 = arith.constant 0 : index
    %3 = vector.load %arg2[%c0_2, %c0_3, %c0_4] : memref<1x16x128xbf16, #tpu.memory_space<vmem>>, vector<1x16x128xbf16>
    %4 = vector.shape_cast %3 : vector<1x16x128xbf16> to vector<16x128xbf16>
    %c0_5 = arith.constant 0 : index
    %c0_6 = arith.constant 0 : index
    %c0_7 = arith.constant 0 : index
    %5 = vector.load %arg3[%c0_5, %c0_6, %c0_7] : memref<1x16x128xbf16, #tpu.memory_space<vmem>>, vector<1x16x128xbf16>
    %6 = vector.shape_cast %5 : vector<1x16x128xbf16> to vector<16x128xbf16>
    %c0_8 = arith.constant 0 : index
    %c0_9 = arith.constant 0 : index
    %7 = vector.load %arg4[%c0_8, %c0_9] : memref<128x128xbf16, #tpu.memory_space<vmem>>, vector<128x128xbf16>
    %cst = arith.constant dense<0.000000e+00> : vector<16x128xf32>
    %8 = tpu.matmul %4, %7, %cst {dimension_numbers = #tpu.dot_dimension_numbers<[1], [0], [0], [1], [0, 0, 1, 1], [], []>} : vector<16x128xbf16>, vector<128x128xbf16>, vector<16x128xf32> -> vector<16x128xf32>
    %c0_10 = arith.constant 0 : index
    %c0_11 = arith.constant 0 : index
    %9 = vector.load %arg5[%c0_10, %c0_11] : memref<1x128xf32, #tpu.memory_space<vmem>>, vector<1x128xf32>
    %10 = vector.broadcast %9 : vector<1x128xf32> to vector<16x128xf32>
    %11 = arith.addf %8, %10 : vector<16x128xf32>
    %c0_12 = arith.constant 0 : index
    %c0_13 = arith.constant 0 : index
    %12 = vector.load %arg6[%c0_12, %c0_13] : memref<128x256xbf16, #tpu.memory_space<vmem>>, vector<128x256xbf16>
    %cst_14 = arith.constant dense<0.000000e+00> : vector<16x256xf32>
    %13 = tpu.matmul %6, %12, %cst_14 {dimension_numbers = #tpu.dot_dimension_numbers<[1], [0], [0], [1], [0, 0, 1, 1], [], []>} : vector<16x128xbf16>, vector<128x256xbf16>, vector<16x256xf32> -> vector<16x256xf32>
    %c0_15 = arith.constant 0 : index
    %c0_16 = arith.constant 0 : index
    %14 = vector.load %arg7[%c0_15, %c0_16] : memref<1x256xf32, #tpu.memory_space<vmem>>, vector<1x256xf32>
    %15 = vector.broadcast %14 : vector<1x256xf32> to vector<16x256xf32>
    %16 = arith.addf %13, %15 : vector<16x256xf32>
    %17 = arith.truncf %11 : vector<16x128xf32> to vector<16x128xbf16>
    %18 = vector.extract_strided_slice %16 {offsets = [0, 0], sizes = [16, 128], strides = [1, 1]} : vector<16x256xf32> to vector<16x128xf32>
    %19 = arith.truncf %18 : vector<16x128xf32> to vector<16x128xbf16>
    %20 = vector.extract_strided_slice %16 {offsets = [0, 128], sizes = [16, 128], strides = [1, 1]} : vector<16x256xf32> to vector<16x128xf32>
    %21 = arith.truncf %20 : vector<16x128xf32> to vector<16x128xbf16>
    %22 = vector.extract_strided_slice %17 {offsets = [0, 0], sizes = [16, 32], strides = [1, 1]} : vector<16x128xbf16> to vector<16x32xbf16>
    %23 = vector.extract_strided_slice %19 {offsets = [0, 0], sizes = [16, 32], strides = [1, 1]} : vector<16x128xbf16> to vector<16x32xbf16>
    %cst_17 = arith.constant dense<0.000000e+00> : vector<16x16xf32>
    %24 = tpu.matmul %22, %23, %cst_17 {dimension_numbers = #tpu.dot_dimension_numbers<[1], [1], [0], [0], [0, 0, 1, 0], [], []>} : vector<16x32xbf16>, vector<16x32xbf16>, vector<16x16xf32> -> vector<16x16xf32>
    %cst_18 = arith.constant dense<0xFF800000> : vector<16xf32>
    %25 = vector.multi_reduction <maximumf>, %24, %cst_18 [1] : vector<16x16xf32> to vector<16xf32>
    %26 = vector.shape_cast %25 : vector<16xf32> to vector<16x1xf32>
    %27 = vector.broadcast %26 : vector<16x1xf32> to vector<16x16xf32>
    %28 = arith.subf %24, %27 : vector<16x16xf32>
    %29 = math.exp %28 : vector<16x16xf32>
    %cst_19 = arith.constant dense<0.000000e+00> : vector<16xf32>
    %30 = vector.multi_reduction <add>, %29, %cst_19 [1] : vector<16x16xf32> to vector<16xf32>
    %31 = vector.shape_cast %30 : vector<16xf32> to vector<16x1xf32>
    %32 = tpu.reciprocal %31 {approx = true} : vector<16x1xf32> -> vector<16x1xf32>
    %33 = vector.broadcast %32 : vector<16x1xf32> to vector<16x16xf32>
    %34 = arith.mulf %29, %33 : vector<16x16xf32>
    %35 = arith.truncf %34 : vector<16x16xf32> to vector<16x16xbf16>
    %36 = vector.extract_strided_slice %21 {offsets = [0, 0], sizes = [16, 32], strides = [1, 1]} : vector<16x128xbf16> to vector<16x32xbf16>
    %cst_20 = arith.constant dense<0.000000e+00> : vector<16x32xf32>
    %37 = tpu.matmul %35, %36, %cst_20 {dimension_numbers = #tpu.dot_dimension_numbers<[1], [0], [0], [1], [0, 0, 1, 1], [], []>} : vector<16x16xbf16>, vector<16x32xbf16>, vector<16x32xf32> -> vector<16x32xf32>
    %c0_21 = arith.constant 0 : index
    %c0_22 = arith.constant 0 : index
    %38 = vector.load %arg13[%c0_21, %c0_22] : memref<16x128xf32, #tpu.memory_space<vmem>>, vector<16x32xf32>
    tpu.vector_store %arg13[%c0_21, %c0_22], %37 {strides = array<i32>} : memref<16x128xf32, #tpu.memory_space<vmem>>, vector<16x32xf32>,
    %39 = vector.extract_strided_slice %17 {offsets = [0, 32], sizes = [16, 32], strides = [1, 1]} : vector<16x128xbf16> to vector<16x32xbf16>
    %40 = vector.extract_strided_slice %19 {offsets = [0, 32], sizes = [16, 32], strides = [1, 1]} : vector<16x128xbf16> to vector<16x32xbf16>
    %cst_23 = arith.constant dense<0.000000e+00> : vector<16x16xf32>
    %41 = tpu.matmul %39, %40, %cst_23 {dimension_numbers = #tpu.dot_dimension_numbers<[1], [1], [0], [0], [0, 0, 1, 0], [], []>} : vector<16x32xbf16>, vector<16x32xbf16>, vector<16x16xf32> -> vector<16x16xf32>
    %cst_24 = arith.constant dense<0xFF800000> : vector<16xf32>
    %42 = vector.multi_reduction <maximumf>, %41, %cst_24 [1] : vector<16x16xf32> to vector<16xf32>
    %43 = vector.shape_cast %42 : vector<16xf32> to vector<16x1xf32>
    %44 = vector.broadcast %43 : vector<16x1xf32> to vector<16x16xf32>
    %45 = arith.subf %41, %44 : vector<16x16xf32>
    %46 = math.exp %45 : vector<16x16xf32>
    %cst_25 = arith.constant dense<0.000000e+00> : vector<16xf32>
    %47 = vector.multi_reduction <add>, %46, %cst_25 [1] : vector<16x16xf32> to vector<16xf32>
    %48 = vector.shape_cast %47 : vector<16xf32> to vector<16x1xf32>
    %49 = tpu.reciprocal %48 {approx = true} : vector<16x1xf32> -> vector<16x1xf32>
    %50 = vector.broadcast %49 : vector<16x1xf32> to vector<16x16xf32>
    %51 = arith.mulf %46, %50 : vector<16x16xf32>
    %52 = arith.truncf %51 : vector<16x16xf32> to vector<16x16xbf16>
    %53 = vector.extract_strided_slice %21 {offsets = [0, 32], sizes = [16, 32], strides = [1, 1]} : vector<16x128xbf16> to vector<16x32xbf16>
    %cst_26 = arith.constant dense<0.000000e+00> : vector<16x32xf32>
    %54 = tpu.matmul %52, %53, %cst_26 {dimension_numbers = #tpu.dot_dimension_numbers<[1], [0], [0], [1], [0, 0, 1, 1], [], []>} : vector<16x16xbf16>, vector<16x32xbf16>, vector<16x32xf32> -> vector<16x32xf32>
    %c0_27 = arith.constant 0 : index
    %c32 = arith.constant 32 : index
    %55 = vector.load %arg13[%c0_27, %c32] : memref<16x128xf32, #tpu.memory_space<vmem>>, vector<16x32xf32>
    tpu.vector_store %arg13[%c0_27, %c32], %54 {strides = array<i32>} : memref<16x128xf32, #tpu.memory_space<vmem>>, vector<16x32xf32>,
    %56 = vector.extract_strided_slice %17 {offsets = [0, 64], sizes = [16, 32], strides = [1, 1]} : vector<16x128xbf16> to vector<16x32xbf16>
    %57 = vector.extract_strided_slice %19 {offsets = [0, 64], sizes = [16, 32], strides = [1, 1]} : vector<16x128xbf16> to vector<16x32xbf16>
    %cst_28 = arith.constant dense<0.000000e+00> : vector<16x16xf32>
    %58 = tpu.matmul %56, %57, %cst_28 {dimension_numbers = #tpu.dot_dimension_numbers<[1], [1], [0], [0], [0, 0, 1, 0], [], []>} : vector<16x32xbf16>, vector<16x32xbf16>, vector<16x16xf32> -> vector<16x16xf32>
    %cst_29 = arith.constant dense<0xFF800000> : vector<16xf32>
    %59 = vector.multi_reduction <maximumf>, %58, %cst_29 [1] : vector<16x16xf32> to vector<16xf32>
    %60 = vector.shape_cast %59 : vector<16xf32> to vector<16x1xf32>
    %61 = vector.broadcast %60 : vector<16x1xf32> to vector<16x16xf32>
    %62 = arith.subf %58, %61 : vector<16x16xf32>
    %63 = math.exp %62 : vector<16x16xf32>
    %cst_30 = arith.constant dense<0.000000e+00> : vector<16xf32>
    %64 = vector.multi_reduction <add>, %63, %cst_30 [1] : vector<16x16xf32> to vector<16xf32>
    %65 = vector.shape_cast %64 : vector<16xf32> to vector<16x1xf32>
    %66 = tpu.reciprocal %65 {approx = true} : vector<16x1xf32> -> vector<16x1xf32>
    %67 = vector.broadcast %66 : vector<16x1xf32> to vector<16x16xf32>
    %68 = arith.mulf %63, %67 : vector<16x16xf32>
    %69 = arith.truncf %68 : vector<16x16xf32> to vector<16x16xbf16>
    %70 = vector.extract_strided_slice %21 {offsets = [0, 64], sizes = [16, 32], strides = [1, 1]} : vector<16x128xbf16> to vector<16x32xbf16>
    %cst_31 = arith.constant dense<0.000000e+00> : vector<16x32xf32>
    %71 = tpu.matmul %69, %70, %cst_31 {dimension_numbers = #tpu.dot_dimension_numbers<[1], [0], [0], [1], [0, 0, 1, 1], [], []>} : vector<16x16xbf16>, vector<16x32xbf16>, vector<16x32xf32> -> vector<16x32xf32>
    %c0_32 = arith.constant 0 : index
    %c64 = arith.constant 64 : index
    %72 = vector.load %arg13[%c0_32, %c64] : memref<16x128xf32, #tpu.memory_space<vmem>>, vector<16x32xf32>
    tpu.vector_store %arg13[%c0_32, %c64], %71 {strides = array<i32>} : memref<16x128xf32, #tpu.memory_space<vmem>>, vector<16x32xf32>,
    %73 = vector.extract_strided_slice %17 {offsets = [0, 96], sizes = [16, 32], strides = [1, 1]} : vector<16x128xbf16> to vector<16x32xbf16>
    %74 = vector.extract_strided_slice %19 {offsets = [0, 96], sizes = [16, 32], strides = [1, 1]} : vector<16x128xbf16> to vector<16x32xbf16>
    %cst_33 = arith.constant dense<0.000000e+00> : vector<16x16xf32>
    %75 = tpu.matmul %73, %74, %cst_33 {dimension_numbers = #tpu.dot_dimension_numbers<[1], [1], [0], [0], [0, 0, 1, 0], [], []>} : vector<16x32xbf16>, vector<16x32xbf16>, vector<16x16xf32> -> vector<16x16xf32>
    %cst_34 = arith.constant dense<0xFF800000> : vector<16xf32>
    %76 = vector.multi_reduction <maximumf>, %75, %cst_34 [1] : vector<16x16xf32> to vector<16xf32>
    %77 = vector.shape_cast %76 : vector<16xf32> to vector<16x1xf32>
    %78 = vector.broadcast %77 : vector<16x1xf32> to vector<16x16xf32>
    %79 = arith.subf %75, %78 : vector<16x16xf32>
    %80 = math.exp %79 : vector<16x16xf32>
    %cst_35 = arith.constant dense<0.000000e+00> : vector<16xf32>
    %81 = vector.multi_reduction <add>, %80, %cst_35 [1] : vector<16x16xf32> to vector<16xf32>
    %82 = vector.shape_cast %81 : vector<16xf32> to vector<16x1xf32>
    %83 = tpu.reciprocal %82 {approx = true} : vector<16x1xf32> -> vector<16x1xf32>
    %84 = vector.broadcast %83 : vector<16x1xf32> to vector<16x16xf32>
    %85 = arith.mulf %80, %84 : vector<16x16xf32>
    %86 = arith.truncf %85 : vector<16x16xf32> to vector<16x16xbf16>
    %87 = vector.extract_strided_slice %21 {offsets = [0, 96], sizes = [16, 32], strides = [1, 1]} : vector<16x128xbf16> to vector<16x32xbf16>
    %cst_36 = arith.constant dense<0.000000e+00> : vector<16x32xf32>
    %88 = tpu.matmul %86, %87, %cst_36 {dimension_numbers = #tpu.dot_dimension_numbers<[1], [0], [0], [1], [0, 0, 1, 1], [], []>} : vector<16x16xbf16>, vector<16x32xbf16>, vector<16x32xf32> -> vector<16x32xf32>
    %c0_37 = arith.constant 0 : index
    %c96 = arith.constant 96 : index
    %89 = vector.load %arg13[%c0_37, %c96] : memref<16x128xf32, #tpu.memory_space<vmem>>, vector<16x32xf32>
    tpu.vector_store %arg13[%c0_37, %c96], %88 {strides = array<i32>} : memref<16x128xf32, #tpu.memory_space<vmem>>, vector<16x32xf32>,
    %c0_38 = arith.constant 0 : index
    %c0_39 = arith.constant 0 : index
    %90 = vector.load %arg13[%c0_38, %c0_39] : memref<16x128xf32, #tpu.memory_space<vmem>>, vector<16x128xf32>
    %91 = arith.truncf %90 : vector<16x128xf32> to vector<16x128xbf16>
    %c0_40 = arith.constant 0 : index
    %c0_41 = arith.constant 0 : index
    %92 = vector.load %arg8[%c0_40, %c0_41] : memref<128x128xbf16, #tpu.memory_space<vmem>>, vector<128x128xbf16>
    %cst_42 = arith.constant dense<0.000000e+00> : vector<16x128xf32>
    %93 = tpu.matmul %91, %92, %cst_42 {dimension_numbers = #tpu.dot_dimension_numbers<[1], [0], [0], [1], [0, 0, 1, 1], [], []>} : vector<16x128xbf16>, vector<128x128xbf16>, vector<16x128xf32> -> vector<16x128xf32>
    %c0_43 = arith.constant 0 : index
    %c0_44 = arith.constant 0 : index
    %94 = vector.load %arg9[%c0_43, %c0_44] : memref<1x128xf32, #tpu.memory_space<vmem>>, vector<1x128xf32>
    %95 = vector.broadcast %94 : vector<1x128xf32> to vector<16x128xf32>
    %96 = arith.addf %93, %95 : vector<16x128xf32>
    %97 = arith.addf %2, %96 : vector<16x128xf32>
    %c0_45 = arith.constant 0 : index
    %c0_46 = arith.constant 0 : index
    %98 = vector.load %arg10[%c0_45, %c0_46] : memref<1x128xf32, #tpu.memory_space<vmem>>, vector<1x128xf32>
    %c0_47 = arith.constant 0 : index
    %c0_48 = arith.constant 0 : index
    %99 = vector.load %arg11[%c0_47, %c0_48] : memref<1x128xf32, #tpu.memory_space<vmem>>, vector<1x128xf32>
    %cst_49 = arith.constant dense<0.000000e+00> : vector<16xf32>
    %100 = vector.multi_reduction <add>, %97, %cst_49 [1] : vector<16x128xf32> to vector<16xf32>
    %101 = vector.shape_cast %100 : vector<16xf32> to vector<16x1xf32>
    %cst_50 = arith.constant 1.280000e+02 : f32
    %102 = vector.broadcast %cst_50 : f32 to vector<16x1xf32>
    %103 = arith.divf %101, %102 : vector<16x1xf32>
    %104 = vector.broadcast %103 : vector<16x1xf32> to vector<16x128xf32>
    %105 = arith.subf %97, %104 : vector<16x128xf32>
    %106 = arith.mulf %105, %105 : vector<16x128xf32>
    %cst_51 = arith.constant dense<0.000000e+00> : vector<16xf32>
    %107 = vector.multi_reduction <add>, %106, %cst_51 [1] : vector<16x128xf32> to vector<16xf32>
    %108 = vector.shape_cast %107 : vector<16xf32> to vector<16x1xf32>
    %cst_52 = arith.constant 1.280000e+02 : f32
    %109 = vector.broadcast %cst_52 : f32 to vector<16x1xf32>
    %110 = arith.divf %108, %109 : vector<16x1xf32>
    %111 = vector.broadcast %103 : vector<16x1xf32> to vector<16x128xf32>
    %112 = arith.subf %97, %111 : vector<16x128xf32>
    %cst_53 = arith.constant 9.99999997E-7 : f32
    %113 = vector.broadcast %cst_53 : f32 to vector<16x1xf32>
    %114 = arith.addf %110, %113 : vector<16x1xf32>
    %115 = math.rsqrt %114 : vector<16x1xf32>
    %116 = vector.broadcast %115 : vector<16x1xf32> to vector<16x128xf32>
    %117 = arith.mulf %112, %116 : vector<16x128xf32>
    %118 = vector.broadcast %98 : vector<1x128xf32> to vector<16x128xf32>
    %119 = arith.mulf %117, %118 : vector<16x128xf32>
    %120 = vector.broadcast %99 : vector<1x128xf32> to vector<16x128xf32>
    %121 = arith.addf %119, %120 : vector<16x128xf32>
    %122 = arith.truncf %121 : vector<16x128xf32> to vector<16x128xbf16>
    %c0_54 = arith.constant 0 : index
    %c0_55 = arith.constant 0 : index
    %c0_56 = arith.constant 0 : index
    %123 = vector.load %arg12[%c0_54, %c0_55, %c0_56] : memref<1x16x128xbf16, #tpu.memory_space<vmem>>, vector<1x16x128xbf16>
    %124 = vector.shape_cast %123 : vector<1x16x128xbf16> to vector<16x128xbf16>
    %125 = vector.shape_cast %122 : vector<16x128xbf16> to vector<1x16x128xbf16>
    tpu.vector_store %arg12[%c0_54, %c0_55, %c0_56], %125 {strides = array<i32>} : memref<1x16x128xbf16, #tpu.memory_space<vmem>>, vector<1x16x128xbf16>,
    return
  }
  func.func @transform_0(%arg0: i32, %arg1: i32) -> (i32, i32, i32) {
    %c0_i32 = arith.constant 0 : i32
    %c0_i32_0 = arith.constant 0 : i32
    return %arg0, %arg1, %c0_i32 : i32, i32, i32
  }
  func.func @transform_1(%arg0: i32, %arg1: i32) -> (i32, i32, i32) {
    %c0_i32 = arith.constant 0 : i32
    %c0_i32_0 = arith.constant 0 : i32
    %c0_i32_1 = arith.constant 0 : i32
    return %arg0, %c0_i32, %c0_i32_0 : i32, i32, i32
  }
  func.func @transform_2(%arg0: i32, %arg1: i32) -> (i32, i32) {
    %c0_i32 = arith.constant 0 : i32
    %c0_i32_0 = arith.constant 0 : i32
    %c0_i32_1 = arith.constant 0 : i32
    return %c0_i32, %c0_i32_0 : i32, i32
  }
  func.func @transform_3(%arg0: i32, %arg1: i32) -> (i32, i32) {
    %c0_i32 = arith.constant 0 : i32
    %c0_i32_0 = arith.constant 0 : i32
    %c0_i32_1 = arith.constant 0 : i32
    return %c0_i32, %c0_i32_0 : i32, i32
  }
  func.func @transform_4(%arg0: i32, %arg1: i32) -> (i32, i32) {
    %c0_i32 = arith.constant 0 : i32
    %c0_i32_0 = arith.constant 0 : i32
    %c0_i32_1 = arith.constant 0 : i32
    return %c0_i32, %c0_i32_0 : i32, i32
  }
  func.func @transform_5(%arg0: i32, %arg1: i32) -> (i32, i32) {
    %c0_i32 = arith.constant 0 : i32
    %c0_i32_0 = arith.constant 0 : i32
    %c0_i32_1 = arith.constant 0 : i32
    return %c0_i32, %c0_i32_0 : i32, i32
  }
  func.func @transform_6(%arg0: i32, %arg1: i32) -> (i32, i32) {
    %c0_i32 = arith.constant 0 : i32
    %c0_i32_0 = arith.constant 0 : i32
    %c0_i32_1 = arith.constant 0 : i32
    return %c0_i32, %c0_i32_0 : i32, i32
  }
  func.func @transform_7(%arg0: i32, %arg1: i32) -> (i32, i32) {
    %c0_i32 = arith.constant 0 : i32
    %c0_i32_0 = arith.constant 0 : i32
    %c0_i32_1 = arith.constant 0 : i32
    return %c0_i32, %c0_i32_0 : i32, i32
  }
  func.func @transform_8(%arg0: i32, %arg1: i32) -> (i32, i32) {
    %c0_i32 = arith.constant 0 : i32
    %c0_i32_0 = arith.constant 0 : i32
    %c0_i32_1 = arith.constant 0 : i32
    return %c0_i32, %c0_i32_0 : i32, i32
  }
  func.func @transform_9(%arg0: i32, %arg1: i32) -> (i32, i32) {
    %c0_i32 = arith.constant 0 : i32
    %c0_i32_0 = arith.constant 0 : i32
    %c0_i32_1 = arith.constant 0 : i32
    return %c0_i32, %c0_i32_0 : i32, i32
  }
  func.func @transform_10(%arg0: i32, %arg1: i32) -> (i32, i32, i32) {
    %c0_i32 = arith.constant 0 : i32
    %c0_i32_0 = arith.constant 0 : i32
    return %arg0, %arg1, %c0_i32 : i32, i32, i32
  }
}

module attributes {stable_mosaic.version = 11 : i64} {
  func.func @_ffn_block_kernel(%arg0: i32, %arg1: memref<16x128xbf16, #tpu.memory_space<vmem>>, %arg2: memref<128x256xbf16, #tpu.memory_space<vmem>>, %arg3: memref<1x256xf32, #tpu.memory_space<vmem>>, %arg4: memref<256x128xbf16, #tpu.memory_space<vmem>>, %arg5: memref<1x128xf32, #tpu.memory_space<vmem>>, %arg6: memref<1x128xf32, #tpu.memory_space<vmem>>, %arg7: memref<1x128xf32, #tpu.memory_space<vmem>>, %arg8: memref<16x128xbf16, #tpu.memory_space<vmem>>) attributes {dimension_semantics = [#tpu.dimension_semantics<parallel>], iteration_bounds = array<i64: 2>, scalar_prefetch = 0 : i64, scratch_operands = 0 : i64, tpu.core_type = #tpu.core_type<tc>, window_params = [{transform_indices = @transform_0, window_bounds = array<i64: 16, 128>}, {pipeline_mode = #tpu.pipeline_mode<synchronous>, transform_indices = @transform_1, window_bounds = array<i64: 128, 256>}, {pipeline_mode = #tpu.pipeline_mode<synchronous>, transform_indices = @transform_2, window_bounds = array<i64: 1, 256>}, {pipeline_mode = #tpu.pipeline_mode<synchronous>, transform_indices = @transform_3, window_bounds = array<i64: 256, 128>}, {pipeline_mode = #tpu.pipeline_mode<synchronous>, transform_indices = @transform_4, window_bounds = array<i64: 1, 128>}, {pipeline_mode = #tpu.pipeline_mode<synchronous>, transform_indices = @transform_5, window_bounds = array<i64: 1, 128>}, {pipeline_mode = #tpu.pipeline_mode<synchronous>, transform_indices = @transform_6, window_bounds = array<i64: 1, 128>}, {transform_indices = @transform_7, window_bounds = array<i64: 16, 128>}]} {
    %c0 = arith.constant 0 : index
    %c0_0 = arith.constant 0 : index
    %0 = vector.load %arg1[%c0, %c0_0] : memref<16x128xbf16, #tpu.memory_space<vmem>>, vector<16x128xbf16>
    %1 = arith.extf %0 : vector<16x128xbf16> to vector<16x128xf32>
    %c0_1 = arith.constant 0 : index
    %c0_2 = arith.constant 0 : index
    %2 = vector.load %arg1[%c0_1, %c0_2] : memref<16x128xbf16, #tpu.memory_space<vmem>>, vector<16x128xbf16>
    %c0_3 = arith.constant 0 : index
    %c0_4 = arith.constant 0 : index
    %3 = vector.load %arg2[%c0_3, %c0_4] : memref<128x256xbf16, #tpu.memory_space<vmem>>, vector<128x256xbf16>
    %cst = arith.constant dense<0.000000e+00> : vector<16x256xf32>
    %4 = tpu.matmul %2, %3, %cst {dimension_numbers = #tpu.dot_dimension_numbers<[1], [0], [0], [1], [0, 0, 1, 1], [], []>} : vector<16x128xbf16>, vector<128x256xbf16>, vector<16x256xf32> -> vector<16x256xf32>
    %c0_5 = arith.constant 0 : index
    %c0_6 = arith.constant 0 : index
    %5 = vector.load %arg3[%c0_5, %c0_6] : memref<1x256xf32, #tpu.memory_space<vmem>>, vector<1x256xf32>
    %6 = vector.broadcast %5 : vector<1x256xf32> to vector<16x256xf32>
    %7 = arith.addf %4, %6 : vector<16x256xf32>
    %cst_7 = arith.constant 0.000000e+00 : f32
    %8 = vector.broadcast %cst_7 : f32 to vector<16x256xf32>
    %9 = arith.maximumf %7, %8 : vector<16x256xf32>
    %10 = arith.truncf %9 : vector<16x256xf32> to vector<16x256xbf16>
    %c0_8 = arith.constant 0 : index
    %c0_9 = arith.constant 0 : index
    %11 = vector.load %arg4[%c0_8, %c0_9] : memref<256x128xbf16, #tpu.memory_space<vmem>>, vector<256x128xbf16>
    %cst_10 = arith.constant dense<0.000000e+00> : vector<16x128xf32>
    %12 = tpu.matmul %10, %11, %cst_10 {dimension_numbers = #tpu.dot_dimension_numbers<[1], [0], [0], [1], [0, 0, 1, 1], [], []>} : vector<16x256xbf16>, vector<256x128xbf16>, vector<16x128xf32> -> vector<16x128xf32>
    %c0_11 = arith.constant 0 : index
    %c0_12 = arith.constant 0 : index
    %13 = vector.load %arg5[%c0_11, %c0_12] : memref<1x128xf32, #tpu.memory_space<vmem>>, vector<1x128xf32>
    %14 = vector.broadcast %13 : vector<1x128xf32> to vector<16x128xf32>
    %15 = arith.addf %12, %14 : vector<16x128xf32>
    %16 = arith.addf %1, %15 : vector<16x128xf32>
    %c0_13 = arith.constant 0 : index
    %c0_14 = arith.constant 0 : index
    %17 = vector.load %arg6[%c0_13, %c0_14] : memref<1x128xf32, #tpu.memory_space<vmem>>, vector<1x128xf32>
    %c0_15 = arith.constant 0 : index
    %c0_16 = arith.constant 0 : index
    %18 = vector.load %arg7[%c0_15, %c0_16] : memref<1x128xf32, #tpu.memory_space<vmem>>, vector<1x128xf32>
    %cst_17 = arith.constant dense<0.000000e+00> : vector<16xf32>
    %19 = vector.multi_reduction <add>, %16, %cst_17 [1] : vector<16x128xf32> to vector<16xf32>
    %20 = vector.shape_cast %19 : vector<16xf32> to vector<16x1xf32>
    %cst_18 = arith.constant 1.280000e+02 : f32
    %21 = vector.broadcast %cst_18 : f32 to vector<16x1xf32>
    %22 = arith.divf %20, %21 : vector<16x1xf32>
    %23 = vector.broadcast %22 : vector<16x1xf32> to vector<16x128xf32>
    %24 = arith.subf %16, %23 : vector<16x128xf32>
    %25 = arith.mulf %24, %24 : vector<16x128xf32>
    %cst_19 = arith.constant dense<0.000000e+00> : vector<16xf32>
    %26 = vector.multi_reduction <add>, %25, %cst_19 [1] : vector<16x128xf32> to vector<16xf32>
    %27 = vector.shape_cast %26 : vector<16xf32> to vector<16x1xf32>
    %cst_20 = arith.constant 1.280000e+02 : f32
    %28 = vector.broadcast %cst_20 : f32 to vector<16x1xf32>
    %29 = arith.divf %27, %28 : vector<16x1xf32>
    %30 = vector.broadcast %22 : vector<16x1xf32> to vector<16x128xf32>
    %31 = arith.subf %16, %30 : vector<16x128xf32>
    %cst_21 = arith.constant 9.99999997E-7 : f32
    %32 = vector.broadcast %cst_21 : f32 to vector<16x1xf32>
    %33 = arith.addf %29, %32 : vector<16x1xf32>
    %34 = math.rsqrt %33 : vector<16x1xf32>
    %35 = vector.broadcast %34 : vector<16x1xf32> to vector<16x128xf32>
    %36 = arith.mulf %31, %35 : vector<16x128xf32>
    %37 = vector.broadcast %17 : vector<1x128xf32> to vector<16x128xf32>
    %38 = arith.mulf %36, %37 : vector<16x128xf32>
    %39 = vector.broadcast %18 : vector<1x128xf32> to vector<16x128xf32>
    %40 = arith.addf %38, %39 : vector<16x128xf32>
    %41 = arith.truncf %40 : vector<16x128xf32> to vector<16x128xbf16>
    %c0_22 = arith.constant 0 : index
    %c0_23 = arith.constant 0 : index
    %42 = vector.load %arg8[%c0_22, %c0_23] : memref<16x128xbf16, #tpu.memory_space<vmem>>, vector<16x128xbf16>
    tpu.vector_store %arg8[%c0_22, %c0_23], %41 {strides = array<i32>} : memref<16x128xbf16, #tpu.memory_space<vmem>>, vector<16x128xbf16>,
    return
  }
  func.func @transform_0(%arg0: i32) -> (i32, i32) {
    %c0_i32 = arith.constant 0 : i32
    %c0_i32_0 = arith.constant 0 : i32
    return %arg0, %c0_i32 : i32, i32
  }
  func.func @transform_1(%arg0: i32) -> (i32, i32) {
    %c0_i32 = arith.constant 0 : i32
    %c0_i32_0 = arith.constant 0 : i32
    %c0_i32_1 = arith.constant 0 : i32
    return %c0_i32, %c0_i32_0 : i32, i32
  }
  func.func @transform_2(%arg0: i32) -> (i32, i32) {
    %c0_i32 = arith.constant 0 : i32
    %c0_i32_0 = arith.constant 0 : i32
    %c0_i32_1 = arith.constant 0 : i32
    return %c0_i32, %c0_i32_0 : i32, i32
  }
  func.func @transform_3(%arg0: i32) -> (i32, i32) {
    %c0_i32 = arith.constant 0 : i32
    %c0_i32_0 = arith.constant 0 : i32
    %c0_i32_1 = arith.constant 0 : i32
    return %c0_i32, %c0_i32_0 : i32, i32
  }
  func.func @transform_4(%arg0: i32) -> (i32, i32) {
    %c0_i32 = arith.constant 0 : i32
    %c0_i32_0 = arith.constant 0 : i32
    %c0_i32_1 = arith.constant 0 : i32
    return %c0_i32, %c0_i32_0 : i32, i32
  }
  func.func @transform_5(%arg0: i32) -> (i32, i32) {
    %c0_i32 = arith.constant 0 : i32
    %c0_i32_0 = arith.constant 0 : i32
    %c0_i32_1 = arith.constant 0 : i32
    return %c0_i32, %c0_i32_0 : i32, i32
  }
  func.func @transform_6(%arg0: i32) -> (i32, i32) {
    %c0_i32 = arith.constant 0 : i32
    %c0_i32_0 = arith.constant 0 : i32
    %c0_i32_1 = arith.constant 0 : i32
    return %c0_i32, %c0_i32_0 : i32, i32
  }
  func.func @transform_7(%arg0: i32) -> (i32, i32) {
    %c0_i32 = arith.constant 0 : i32
    %c0_i32_0 = arith.constant 0 : i32
    return %arg0, %c0_i32 : i32, i32
  }
}

</mosaic_0001>

<bundles_post_ra>
// kernel: transformer_decoder.5
= control target key start
LH: loop header
LB: loop body
LE: loop exit
PB: predicated region body
PF: predicated region fallthrough
CT: control target
= control target key end

     0   :  { %s917_s24 = smov 0   ;;  %s1049_s0 = inlined_call_operand.vmem [shape: bf16[32,128], index: 0, kind: input, shape index: {}, may-alias: {0,7}]   ;;  %s1050_s1 = inlined_call_operand.vmem [shape: bf16[128,256], index: 1, kind: input, shape index: {}]   ;;  %s1051_s2 = inlined_call_operand.vmem [shape: f32[1,256], index: 2, kind: input, shape index: {}]   ;;  %s1052_s3 = inlined_call_operand.vmem [shape: bf16[256,128], index: 3, kind: input, shape index: {}]   ;;  %s1053_s4 = inlined_call_operand.vmem [shape: f32[1,128], index: 4, kind: input, shape index: {}]   ;;  %s1054_s5 = inlined_call_operand.vmem [shape: f32[1,128], index: 5, kind: input, shape index: {}]   ;;  %s1055_s6 = inlined_call_operand.vmem [shape: f32[1,128], index: 6, kind: input, shape index: {}]   ;;  %s1056_s7 = inlined_call_operand.vmem [shape: bf16[32,128], index: 7, kind: output, shape index: {}, may-alias: {0,7}]  }
   0x1 LB: > { %s735_s25 = sadd.s32 4294967295, %s874_s24   ;;  %p739_p0 = scmp.ge.s32.totalorder %s874_s24, 1  ;;  %s874_s24 = sphi %s917_s24, %s17_s24  }
   0x2   : > { %p238_p1 = scmp.lt.s32.totalorder %s874_s24, 3 }
   0x4   : > { %p239_p2 = pnand %p739_p0, %p238_p1 }
   0x5   : > { %v822_v0 = vld [vmem:[%s1050_s1 + $0x4] ss:$8 sps:$4 sm:$0xff] (!%p239_p2)   ;;  %v824_v1 = vld [vmem:[%s1050_s1] ss:$8 sps:$4 sm:$0xff] (!%p239_p2)   ;;  %v876_v2 = vmov (!%p239_p2), 0   ;;  %s740_s17 = sshll.u32 (!%p239_p2), %s735_s25, 1  ;;  %v305_v34 = vlaneseq (!%p239_p2) }
   0x6   : > { %242 = sbr.rel (%p239_p2) target bundleno = 797 (0x31d), region = 48  ;;  %433 = vmatprep.mubr.bf16.mxu0 (!%p239_p2), %v876_v2  ;;  %401 = vmatprep.subr.bf16.mxu0 (!%p239_p2), %v822_v0  ;;  %v825_v3 = vld [vmem:[%s1050_s1 + $0x14] ss:$8 sps:$4 sm:$0xff] (!%p239_p2)   ;;  %v827_v4 = vld [vmem:[%s1050_s1 + $0x10] ss:$8 sps:$4 sm:$0xff] (!%p239_p2)   ;;  %p271_p3 = scmp.lt.s32.totalorder (!%p239_p2), %s740_s17, 3 }
   0x7   : > { %402 = vmatpush1.bf16.msra.mxu0 (!%p239_p2), %v824_v1  ;;  %v828_v5 = vld [vmem:[%s1050_s1 + $0x24] ss:$8 sps:$4 sm:$0xff] (!%p239_p2)   ;;  %v830_v6 = vld [vmem:[%s1050_s1 + $0x20] ss:$8 sps:$4 sm:$0xff] (!%p239_p2)   ;;  %v831_v7 = vld [vmem:[%s1050_s1 + $0x34] ss:$8 sps:$4 sm:$0xff] (!%p239_p2)  }
   0x8   : > { %403 = vmatprep.subr.bf16.mxu0 (!%p239_p2), %v825_v3  ;;  %v833_v8 = vld [vmem:[%s1050_s1 + $0x30] ss:$8 sps:$4 sm:$0xff] (!%p239_p2)   ;;  %v834_v9 = vld [vmem:[%s1050_s1 + $0x44] ss:$8 sps:$4 sm:$0xff] (!%p239_p2)   ;;  %v836_v12 = vld [vmem:[%s1050_s1 + $0x40] ss:$8 sps:$4 sm:$0xff] (!%p239_p2)  }
   0x9   : > { %v847_v10 = vld [vmem:[%s1052_s3 + $0x40] sm:$0xff] (!%p239_p2)   ;;  %v849_v13 = vld [vmem:[%s1052_s3 + $0x48] sm:$0xff] (!%p239_p2)   ;;  %v851_v15 = vld [vmem:[%s1052_s3 + $0x50] sm:$0xff] (!%p239_p2)   ;;  %v306_v35 = vshrl.u32 (!%p239_p2), %v305_v34, 7 }
   0xa   : > { %v848_v11 = vld [vmem:[%s1052_s3] sm:$0xff] (!%p239_p2)   ;;  %791 = vmatprep.subr.bf16.mxu1 (!%p239_p2), %v847_v10  ;;  %v850_v14 = vld [vmem:[%s1052_s3 + $0x8] sm:$0xff] (!%p239_p2)   ;;  %v837_v16 = vld [vmem:[%s1050_s1 + $0x54] ss:$8 sps:$4 sm:$0xff] (!%p239_p2)  }
   0xb   : > { %404 = vmatpush1.bf16.msra.mxu0 (!%p239_p2), %v827_v4  ;;  %792 = vmatpush3.bf16.msra.mxu1 (!%p239_p2), %v848_v11  ;;  %v839_v17 = vld [vmem:[%s1050_s1 + $0x50] ss:$8 sps:$4 sm:$0xff] (!%p239_p2)   ;;  %v840_v20 = vld [vmem:[%s1050_s1 + $0x64] ss:$8 sps:$4 sm:$0xff] (!%p239_p2)   ;;  %v842_v21 = vld [vmem:[%s1050_s1 + $0x60] ss:$8 sps:$4 sm:$0xff] (!%p239_p2)  }
   0xc   : > { %405 = vmatprep.subr.bf16.mxu0 (!%p239_p2), %v828_v5  ;;  %793 = vmatprep.subr.bf16.mxu1 (!%p239_p2), %v849_v13  ;;  %v852_v18 = vld [vmem:[%s1052_s3 + $0x10] sm:$0xff] (!%p239_p2)   ;;  %v853_v19 = vld [vmem:[%s1052_s3 + $0x58] sm:$0xff] (!%p239_p2)   ;;  %v855_v24 = vld [vmem:[%s1052_s3 + $0x60] sm:$0xff] (!%p239_p2)   ;;  %v307_v36 = vsub.s32 (!%p239_p2), 0, %v306_v35  ;;  %v311_v38 = vsub.s32 (!%p239_p2), 1, %v306_v35 }
   0xd   : > { %s1058_s17 = smov (!%p271_p3, %s740_s17), 3  ;;  %v854_v22 = vld [vmem:[%s1052_s3 + $0x18] sm:$0xff]   ;;  %v856_v25 = vld [vmem:[%s1052_s3 + $0x20] sm:$0xff]   ;;  %v857_v28 = vld [vmem:[%s1052_s3 + $0x68] sm:$0xff]  }
   0xe   : > { %s741_s27 = sshll.u32 %s1058_s17, 2  ;;  %v843_v23 = vld [vmem:[%s1050_s1 + $0x74] ss:$8 sps:$4 sm:$0xff]   ;;  %v845_v26 = vld [vmem:[%s1050_s1 + $0x70] ss:$8 sps:$4 sm:$0xff]   ;;  %v858_v29 = vld [vmem:[%s1052_s3 + $0x28] sm:$0xff]  }
   0xf   : > { %406 = vmatpush1.bf16.msra.mxu0 %v830_v6  ;;  %794 = vmatpush3.bf16.msra.mxu1 %v850_v14  ;;  %s274_s12 = scalar_lea.vmem %s1049_s0, %s741_s27  ;;  %v859_v30 = vld [vmem:[%s1052_s3 + $0x70] sm:$0xff]   ;;  %v861_v32 = vld [vmem:[%s1052_s3 + $0x78] sm:$0xff]   ;;  %v303_v37 = vld [vmem:[%s1051_s2] sm:$0x3]  ;;  %s280_s20 = scalar_lea.vmem %s1056_s7, %s741_s27 }
  0x10   : > { %407 = vmatprep.subr.bf16.mxu0 %v831_v7  ;;  %795 = vmatprep.subr.bf16.mxu1 %v851_v15  ;;  %v283_v27 = vld [vmem:[%s274_s12] sm:$0xff]   ;;  %v860_v31 = vld [vmem:[%s1052_s3 + $0x30] sm:$0xff]   ;;  %v862_v33 = vld [vmem:[%s1052_s3 + $0x38] sm:$0xff]   ;;  %v308_v39 = vrot.slane %v303_v37, %v307_v36  ;;  %v312_v40 = vrot.slane %v303_v37, %v311_v38 }
  0x11   : > { %v761_v56 = vld [vmem:[%s1053_s4] ss:$0 sm:$0xff]  ;;  %v285_v60 = vunpack.c.l.bf16 %v283_v27  ;;  %v286_v2 = vunpack.c.h.bf16 %v283_v27 }
  0x13   : > { %408 = vmatpush1.bf16.msra.mxu0 %v833_v8  ;;  %796 = vmatpush3.bf16.msra.mxu1 %v852_v18 }
  0x14   : > { %409 = vmatprep.subr.bf16.mxu0 %v834_v9  ;;  %797 = vmatprep.subr.bf16.mxu1 %v853_v19 }
  0x17   : > { %410 = vmatpush1.bf16.msra.mxu0 %v836_v12  ;;  %798 = vmatpush3.bf16.msra.mxu1 %v854_v22 }
  0x18   : > { %411 = vmatprep.subr.bf16.mxu0 %v837_v16  ;;  %799 = vmatprep.subr.bf16.mxu1 %v855_v24  ;;  %v779_v24 = vld [vmem:[%s1055_s6] ss:$0 sm:$0xff] }
  0x1b   : > { %412 = vmatpush1.bf16.msra.mxu0 %v839_v17  ;;  %800 = vmatpush3.bf16.msra.mxu1 %v856_v25 }
  0x1c   : > { %413 = vmatprep.subr.bf16.mxu0 %v840_v20  ;;  %801 = vmatprep.subr.bf16.mxu1 %v857_v28  ;;  %v778_v20 = vld [vmem:[%s1054_s5] ss:$0 sm:$0xff] }
  0x1f   : > { %414 = vmatpush1.bf16.msra.mxu0 %v842_v21  ;;  %802 = vmatpush3.bf16.msra.mxu1 %v858_v29 }
  0x20   : > { %415 = vmatprep.subr.bf16.mxu0 %v843_v23  ;;  %803 = vmatprep.subr.bf16.mxu1 %v859_v30 }
  0x23   : > { %416 = vmatpush1.bf16.msra.mxu0 %v845_v26  ;;  %804 = vmatpush3.bf16.msra.mxu1 %v860_v31 }
  0x24   : > { %805 = vmatprep.subr.bf16.mxu1 %v861_v32 }
  0x26   : > { %434 = vmatmul.mubr.bf16.vlgmr.msra.gmra.mrb[0].mxu0 %v283_v27 }
  0x27   : > { %806 = vmatpush3.bf16.msra.mxu1 %v862_v33 }
  0xf9   : > { %v435_v41 = vpop.f32.mrb[0].mxu0 }
  0xfa   : > { %v436_v42 = vadd.f32 %v435_v41, %v308_v39  ;;  %v437_v43 = vpop.f32.mrb[1].mxu0 }
  0xfb   : > { %v438_v44 = vadd.f32 %v437_v43, %v312_v40  ;;  %v439_v45 = vpop.f32.mrb[2].mxu0 }
  0xfc   : > { %v440_v46 = vadd.f32 %v439_v45, %v308_v39  ;;  %v441_v47 = vpop.f32.mrb[3].mxu0  ;;  %v444_v49 = vmax.f32 %v436_v42, 0.0 }
  0xfd   : > { %v442_v48 = vadd.f32 %v441_v47, %v312_v40  ;;  %v445_v51 = vmax.f32 %v438_v44, 0.0 }
  0xfe   : > { %v446_v50 = vmax.f32 %v440_v46, 0.0 }
  0xff   : > { %v447_v52 = vmax.f32 %v442_v48, 0.0 }
 0x100   : > { %v448_v53 = vpack.c.bf16 %v446_v50, %v444_v49 }
 0x101   : > { %v449_v54 = vpack.c.bf16 %v447_v52, %v445_v51 }
 0x103   : > { %617 = vmatprep.mubr.bf16.mxu1 %v449_v54 }
 0x104   : > { %618 = vmatmul.mubr.bf16.vlgmr.msra.gmra.mrb[0].mxu1 %v448_v53 }
 0x1d7   : > { %v807_v55 = vpop.f32.mrb[0].mxu1 }
 0x1d8   : > { %v808_v57 = vpop.f32.mrb[1].mxu1 }
 0x1d9   : > { %v809_v58 = vadd.f32 %v808_v57, %v807_v55  ;;  %v810_v59 = vpop.f32.mrb[2].mxu1 }
 0x1da   : > { %v811_v61 = vpop.f32.mrb[3].mxu1 }
 0x1db   : > { %v620_v62 = vadd.f32 %v809_v58, %v761_v56  ;;  %v812_v63 = vadd.f32 %v811_v61, %v810_v59 }
 0x1dd   : > { %v623_v0 = vadd.f32 %v812_v63, %v761_v56  ;;  %v626_v1 = vadd.f32 %v620_v62, %v285_v60 }
 0x1df   : > { %630 = vadd.xlane.f32.xlu0 %v626_v1  ;;  %v627_v3 = vadd.f32 %v623_v0, %v286_v2 }
 0x1e3   : > { %632 = vadd.xlane.f32.xlu0 %v627_v3 }
 0x26c   : > { %v631_v4 = vpop.xlane.xlu0 %630 }
 0x26d   : > { %v635_v5 = vmul.f32 0.0078125, %v631_v4 }
 0x26f   : > { %v637_v6 = vsub.f32 %v626_v1, %v635_v5 }
 0x270   : > { %v633_v7 = vpop.xlane.xlu0 %632 }
 0x271   : > { %v636_v8 = vmul.f32 0.0078125, %v633_v7  ;;  %v639_v9 = vmul.f32 %v637_v6, %v637_v6 }
 0x273   : > { %v638_v10 = vsub.f32 %v627_v3, %v636_v8  ;;  %641 = vadd.xlane.f32.xlu1 %v639_v9 }
 0x275   : > { %v640_v11 = vmul.f32 %v638_v10, %v638_v10 }
 0x277   : > { %643 = vadd.xlane.f32.xlu1 %v640_v11 }
 0x300   : > { %v642_v12 = vpop.xlane.xlu1 %641 }
 0x301   : > { %v645_v13 = vmul.f32 0.0078125, %v642_v12 }
 0x303   : > { %v647_v14 = vadd.f32 1e-06, %v645_v13 }
 0x304   : > { %v644_v15 = vpop.xlane.xlu1 %643 }
 0x305   : > { %864 = vrsqrt.f32 %v647_v14  ;;  %v646_v16 = vmul.f32 0.0078125, %v644_v15 }
 0x307   : > { %v648_v17 = vadd.f32 1e-06, %v646_v16 }
 0x309   : > { %866 = vrsqrt.f32 %v648_v17 }
 0x30f   : > { %v865_v18 = vpop.eup %864 }
 0x310   : > { %v651_v19 = vmul.f32 %v865_v18, %v637_v6 }
 0x312   : > { %v659_v22 = vmul.f32 %v778_v20, %v651_v19 }
 0x313   : > { %v867_v21 = vpop.eup %866 }
 0x314   : > { %v652_v23 = vmul.f32 %v867_v21, %v638_v10  ;;  %v667_v26 = vadd.f32 %v779_v24, %v659_v22 }
 0x316   : > { %v660_v25 = vmul.f32 %v778_v20, %v652_v23 }
 0x318   : > { %v668_v27 = vadd.f32 %v779_v24, %v660_v25 }
 0x31a   : > { %v789_v28 = vpack.c.bf16 %v668_v27, %v667_v26 }
 0x31c   : > { %790 = vst [vmem:[%s280_s20] sm:$0xff] %v789_v28  }
 0x31d PF: > { %s17_s24 = sadd.s32 1, %s874_s24  }
 0x31e   : > { %p14_p4 = scmp.ge.s32.totalorder %s17_s24, 4  }
 0x320   :  { %16 = sbr.rel (!%p14_p4) target bundleno = 1 (0x1), region = 78 }

// kernel: transformer_decoder.4
= control target key start
LH: loop header
LB: loop body
LE: loop exit
PB: predicated region body
PF: predicated region fallthrough
CT: control target
= control target key end

     0   :  { %s1875_s13 = smov 0   ;;  %s1877_s14 = smov 0   ;;  %s2131_s0 = inlined_call_operand.vmem [shape: bf16[2,16,128], index: 0, kind: input, shape index: {}, may-alias: {0,10}]   ;;  %s2132_s1 = inlined_call_operand.vmem [shape: bf16[2,16,128], index: 1, kind: input, shape index: {}]   ;;  %s2133_s2 = inlined_call_operand.vmem [shape: bf16[128,128], index: 2, kind: input, shape index: {}]   ;;  %s2134_s3 = inlined_call_operand.vmem [shape: f32[1,128], index: 3, kind: input, shape index: {}]   ;;  %s2135_s4 = inlined_call_operand.vmem [shape: bf16[128,256], index: 4, kind: input, shape index: {}]   ;;  %s2136_s5 = inlined_call_operand.vmem [shape: f32[1,256], index: 5, kind: input, shape index: {}]   ;;  %s2137_s6 = inlined_call_operand.vmem [shape: bf16[128,128], index: 6, kind: input, shape index: {}]   ;;  %s2138_s7 = inlined_call_operand.vmem [shape: f32[1,128], index: 7, kind: input, shape index: {}]   ;;  %s2139_s8 = inlined_call_operand.vmem [shape: f32[1,128], index: 8, kind: input, shape index: {}]   ;;  %s2140_s9 = inlined_call_operand.vmem [shape: f32[1,128], index: 9, kind: input, shape index: {}]   ;;  %s2141_s10 = inlined_call_operand.vmem [shape: bf16[2,16,128], index: 10, kind: output, shape index: {}, may-alias: {0,10}]  }
   0x1   :  { %s1879_s15 = smov 0  }
   0x2 LB: > { %s32_s16 = sadd.s32 1, %s1808_s14  ;;  %p1492_p0 = scmp.ge.s32.totalorder %s1812_s15, 1  ;;  %s1812_s15 = sphi %s1879_s15, %s20_s15   ;;  %s1808_s14 = sphi %s1877_s14, %s2143_s14   ;;  %s1804_s13 = sphi %s1875_s13, %s2142_s13  }
   0x3   : > { %p34_p1 = scmp.ge.s32.totalorder %s32_s16, 2  ;;  %p343_p2 = scmp.lt.s32.totalorder %s1812_s15, 3 }
   0x5   : > { %s2145_s16 = smov (%p34_p1, %s32_s16), 0  ;;  %p344_p3 = pnand %p1492_p0, %p343_p2 }
   0x6   : > { %v1711_v0 = vld [vmem:[%s2135_s4 + $0x4] ss:$8 sps:$4 sm:$0xff] (!%p344_p3)   ;;  %v1713_v1 = vld [vmem:[%s2135_s4] ss:$8 sps:$4 sm:$0xff] (!%p344_p3)   ;;  %v1814_v2 = vmov (!%p344_p3), 0.0   ;;  %v1815_v3 = vmov (!%p344_p3), 0   ;;  %v562_v28 = vlaneseq (!%p344_p3) }
   0x7   : > { %347 = sbr.rel (%p344_p3) target bundleno = 2240 (0x8c0), region = 60  ;;  %1593 = vmatprep.subr.bf16.mxu0 (!%p344_p3), %v1814_v2  ;;  %690 = vmatprep.mubr.bf16.mxu1 (!%p344_p3), %v1815_v3  ;;  %v1714_v4 = vld [vmem:[%s2135_s4 + $0x14] ss:$8 sps:$4 sm:$0xff] (!%p344_p3)   ;;  %v1716_v5 = vld [vmem:[%s2135_s4 + $0x10] ss:$8 sps:$4 sm:$0xff] (!%p344_p3)   ;;  %vm1816_vm0 = vmmov (!%p344_p3), 0  }
   0x8   : > { %658 = vmatprep.subr.bf16.mxu1 (!%p344_p3), %v1711_v0  ;;  %1609 = vmatprep.mubr.msk.bf16.mxu0 (!%p344_p3), %vm1816_vm0, %v1814_v2  ;;  %v1717_v6 = vld [vmem:[%s2133_s2] sm:$0xff] (!%p344_p3)   ;;  %v1721_v8 = vld [vmem:[%s2133_s2 + $0x8] sm:$0xff] (!%p344_p3)   ;;  %p395_p4 = scmp.lt.s32.totalorder (!%p344_p3), %s1804_s13, 1  ;;  %v1722_v10 = vld [vmem:[%s2135_s4 + $0x34] ss:$8 sps:$4 sm:$0xff] (!%p344_p3)   ;;  %v563_v29 = vshrl.u32 (!%p344_p3), %v562_v28, 7 }
   0x9   : > { %659 = vmatpush1.bf16.msra.mxu1 (!%p344_p3), %v1713_v1  ;;  %v1718_v7 = vld [vmem:[%s2135_s4 + $0x24] ss:$8 sps:$4 sm:$0xff] (!%p344_p3)   ;;  %1594 = vmatpush3.bf16.msra.mxu0 (!%p344_p3), %v1717_v6  ;;  %v1720_v9 = vld [vmem:[%s2135_s4 + $0x20] ss:$8 sps:$4 sm:$0xff] (!%p344_p3)   ;;  %v1725_v11 = vld [vmem:[%s2133_s2 + $0x10] sm:$0xff] (!%p344_p3)   ;;  %vm704_vm1 = vcmask (!%p344_p3), 261120  }
   0xa   : > { %660 = vmatprep.subr.bf16.mxu1 (!%p344_p3), %v1714_v4  ;;  %1595 = vmatprep.subr.bf16.mxu0 (!%p344_p3), %v1814_v2  ;;  %v1724_v12 = vld [vmem:[%s2135_s4 + $0x30] ss:$8 sps:$4 sm:$0xff] (!%p344_p3)   ;;  %v1726_v13 = vld [vmem:[%s2135_s4 + $0x44] ss:$8 sps:$4 sm:$0xff] (!%p344_p3)   ;;  %v1728_v15 = vld [vmem:[%s2135_s4 + $0x40] ss:$8 sps:$4 sm:$0xff] (!%p344_p3)  }
   0xb   : > { %v1729_v14 = vld [vmem:[%s2133_s2 + $0x18] sm:$0xff] (!%p344_p3)   ;;  %v1733_v17 = vld [vmem:[%s2133_s2 + $0x20] sm:$0xff] (!%p344_p3)   ;;  %v1737_v20 = vld [vmem:[%s2133_s2 + $0x28] sm:$0xff] (!%p344_p3)   ;;  %v564_v30 = vsub.s32 (!%p344_p3), 0, %v563_v29  ;;  %v568_v32 = vsub.s32 (!%p344_p3), 1, %v563_v29  ;;  %vm752_vm2 = vcmask (!%p344_p3), 130048  }
   0xc   : > { %v1730_v16 = vld [vmem:[%s2135_s4 + $0x54] ss:$8 sps:$4 sm:$0xff] (!%p344_p3)   ;;  %v1732_v18 = vld [vmem:[%s2135_s4 + $0x50] ss:$8 sps:$4 sm:$0xff] (!%p344_p3)   ;;  %v1734_v19 = vld [vmem:[%s2135_s4 + $0x64] ss:$8 sps:$4 sm:$0xff] (!%p344_p3)  }
   0xd   : > { %661 = vmatpush1.bf16.msra.mxu1 (!%p344_p3), %v1716_v5  ;;  %1596 = vmatpush3.bf16.msra.mxu0 (!%p344_p3), %v1721_v8  ;;  %v1736_v21 = vld [vmem:[%s2135_s4 + $0x60] ss:$8 sps:$4 sm:$0xff] (!%p344_p3)   ;;  %v1738_v22 = vld [vmem:[%s2135_s4 + $0x74] ss:$8 sps:$4 sm:$0xff] (!%p344_p3)   ;;  %v1740_v24 = vld [vmem:[%s2135_s4 + $0x70] ss:$8 sps:$4 sm:$0xff] (!%p344_p3)  }
   0xe   : > { %662 = vmatprep.subr.bf16.mxu1 %v1718_v7  ;;  %s2147_s13 = smov (!%p395_p4, %s1804_s13), 1  ;;  %1597 = vmatprep.subr.bf16.mxu0 %v1814_v2  ;;  %v1741_v23 = vld [vmem:[%s2133_s2 + $0x30] sm:$0xff]   ;;  %v1743_v25 = vld [vmem:[%s2133_s2 + $0x38] sm:$0xff]   ;;  %v560_v31 = vld [vmem:[%s2136_s5] sm:$0x3]  ;;  %s1817_s28 = smov 96  }
   0xf   : > { %s1941_s27 = sshll.u32 %s2147_s13, 3  ;;  %v565_v33 = vrot.slane %v560_v31, %v564_v30  ;;  %v569_v35 = vrot.slane %v560_v31, %v568_v32  ;;  %v1499_v36 = vld [vmem:[%s2134_s3] ss:$0 sm:$0xff]  ;;  %s1818_s29 = smov 32   ;;  %vm954_vm3 = vcmask 523520   ;;  %vm1086_vm4 = vcmask 785920  }
  0x10   : > { %s408_s18 = scalar_lea.vmem %s2132_s1, %s1941_s27  ;;  %s402_s19 = scalar_lea.vmem %s2131_s0, %s1941_s27  ;;  %vm1218_vm5 = vcmask 1048320  }
  0x11   : > { %663 = vmatpush1.bf16.msra.mxu1 %v1720_v9  ;;  %1598 = vmatpush3.bf16.msra.mxu0 %v1725_v11  ;;  %v1988_v26 = vld [vmem:[%s402_s19] sm:$0xff]   ;;  %s1819_s30 = smov 64   ;;  %s417_s23 = scalar_lea.vmem %s2141_s10, %s1941_s27 }
  0x12   : > { %664 = vmatprep.subr.bf16.mxu1 %v1722_v10  ;;  %1599 = vmatprep.subr.bf16.mxu0 %v1814_v2  ;;  %v1742_v27 = vld [vmem:[%s408_s18] sm:$0xff]  }
  0x15   : > { %665 = vmatpush1.bf16.msra.mxu1 %v1724_v12  ;;  %1600 = vmatpush3.bf16.msra.mxu0 %v1729_v14 }
  0x16   : > { %666 = vmatprep.subr.bf16.mxu1 %v1726_v13  ;;  %1601 = vmatprep.subr.bf16.mxu0 %v1814_v2 }
  0x19   : > { %667 = vmatpush1.bf16.msra.mxu1 %v1728_v15  ;;  %1602 = vmatpush3.bf16.msra.mxu0 %v1733_v17 }
  0x1a   : > { %668 = vmatprep.subr.bf16.mxu1 %v1730_v16  ;;  %1603 = vmatprep.subr.bf16.mxu0 %v1814_v2 }
  0x1d   : > { %669 = vmatpush1.bf16.msra.mxu1 %v1732_v18  ;;  %1604 = vmatpush3.bf16.msra.mxu0 %v1737_v20 }
  0x1e   : > { %670 = vmatprep.subr.bf16.mxu1 %v1734_v19  ;;  %1605 = vmatprep.subr.bf16.mxu0 %v1814_v2 }
  0x21   : > { %671 = vmatpush1.bf16.msra.mxu1 %v1736_v21  ;;  %1606 = vmatpush3.bf16.msra.mxu0 %v1741_v23 }
  0x22   : > { %672 = vmatprep.subr.bf16.mxu1 %v1738_v22  ;;  %1607 = vmatprep.subr.bf16.mxu0 %v1814_v2 }
  0x25   : > { %673 = vmatpush1.bf16.msra.mxu1 %v1740_v24  ;;  %1608 = vmatpush3.bf16.msra.mxu0 %v1743_v25 }
  0x26   : > { %1613 = vmatprep.subr.bf16.mxu1 %v1814_v2  ;;  %1637 = vmatprep.subr.bf16.mxu0 %v1814_v2 }
  0x28   : > { %691 = vmatmul.mubr.bf16.vlgmr.msra.gmra.mrb[0].mxu1 %v1742_v27  ;;  %1610 = vmatmul.mubr.bf16.vlgmr.msra.gmra.mrb[0].mxu0 %v1988_v26 }
  0x29   : > { %1615 = vmatprep.mubr.msk.bf16.mxu1 %vm1816_vm0, %v1814_v2  ;;  %1639 = vmatprep.mubr.msk.bf16.mxu0 %vm1816_vm0, %v1814_v2 }
  0xfb   : > { %v692_v34 = vpop.f32.mrb[0].mxu1  ;;  %v537_v39 = vpop.f32.mrb[0].mxu0 }
  0xfc   : > { %v694_v37 = vpop.f32.mrb[1].mxu1  ;;  %v693_v40 = vadd.f32 %v692_v34, %v565_v33  ;;  %v538_v43 = vadd.f32 %v1499_v36, %v537_v39  ;;  %v1611_v44 = vpop.f32.mrb[1].mxu0 }
  0xfd   : > { %v696_v38 = vpop.f32.mrb[2].mxu1  ;;  %v695_v45 = vadd.f32 %v694_v37, %v569_v35  ;;  %v540_v47 = vpop.f32.mrb[2].mxu0 }
  0xfe   : > { %v697_v41 = vadd.f32 %v696_v38, %v565_v33  ;;  %v698_v42 = vpop.f32.mrb[3].mxu1  ;;  %v541_v49 = vadd.f32 %v1499_v36, %v540_v47  ;;  %v1612_v50 = vpop.f32.mrb[3].mxu0 }
  0xff   : > { %v699_v46 = vadd.f32 %v698_v42, %v569_v35 }
 0x100   : > { %v702_v48 = vpack.c.bf16 %v697_v41, %v693_v40  ;;  %v701_v52 = vpack.c.bf16 %v541_v49, %v538_v43 }
 0x101   : > { %v2004_v51 = vpack.c.bf16 %v699_v46, %v695_v45 }
 0x102   : > { %v709_v53 = vsel %vm704_vm1, %v702_v48, 0 }
 0x103   : > { %1614 = vmatpush3.bf16.xpose.msra.mxu1 %v709_v53 }
 0x104   : > { %1619 = vmatprep.subr.bf16.mxu1 %v1814_v2 }
 0x10a   : > { %1616 = vmatmul.mubr.msk.bf16.vlgmr.msra.gmra.mrb[4].mxu1 %vm704_vm1, %v701_v52 }
 0x10b   : > { %1620 = vmatpush3.bf16.msra.mxu1 %v2004_v51  ;;  %1621 = vmatprep.mubr.msk.bf16.mxu1 %vm1816_vm0, %v1814_v2 }
 0x10c   : > { %1625 = vmatprep.subr.bf16.mxu1 %v1814_v2 }
 0x1dd   : > { %v745_v54 = vpop.f32.mrb[4].mxu1 }
 0x1de   : > { %v1617_v55 = vpop.f32.mrb[5].mxu1  ;;  %v753_v56 = vsel %vm752_vm2, %v745_v54, -inf }
 0x1df   : > { %754 = vmax.xlane.f32.xlu0 %v753_v56  ;;  %v748_v57 = vpop.f32.mrb[6].mxu1 }
 0x1e0   : > { %v1618_v58 = vpop.f32.mrb[7].mxu1  ;;  %v756_v59 = vsel %vm752_vm2, %v748_v57, -inf }
 0x1e3   : > { %757 = vmax.xlane.f32.xlu0 %v756_v59 }
 0x1f9   : > { %826 = vrot.lane.b32.xlu0 %v702_v48, %s1817_s28 }
 0x1fd   : > { %1091 = vrot.lane.b32.xlu0 %v702_v48, %s1818_s29 }
 0x26c   : > { %v755_v60 = vpop.xlane.xlu0 %754 }
 0x26d   : > { %v759_v61 = vsub.f32 %v745_v54, %v755_v60 }
 0x26f   : > { %v761_v62 = vmul.f32 1.442695, %v759_v61 }
 0x270   : > { %v758_v63 = vpop.xlane.xlu0 %757 }
 0x271   : > { %1754 = vpow2.f32 %v761_v62  ;;  %v760_v0 = vsub.f32 %v748_v57, %v758_v63 }
 0x273   : > { %v763_v1 = vmul.f32 1.442695, %v760_v0 }
 0x274   : > { %v827_v10 = vpop.permute.xlu0 %826 }
 0x275   : > { %1756 = vpow2.f32 %v763_v1  ;;  %v832_v19 = vsel %vm704_vm1, %v827_v10, 0 }
 0x278   : > { %v1092_v17 = vpop.permute.xlu0 %1091 }
 0x279   : > { %v1097_v21 = vsel %vm704_vm1, %v1092_v17, 0 }
 0x27b   : > { %v1755_v3 = vpop.eup %1754 }
 0x27c   : > { %v765_v4 = vsel %vm752_vm2, %v1755_v3, 0.0 }
 0x27d   : > { %766 = vadd.xlane.f32.xlu1 %v765_v4 }
 0x27f   : > { %v1757_v5 = vpop.eup %1756 }
 0x280   : > { %v768_v6 = vsel %vm752_vm2, %v1757_v5, 0.0 }
 0x281   : > { %769 = vadd.xlane.f32.xlu1 %v768_v6 }
 0x292   : > { %823 = vrot.lane.b32.xlu1 %v701_v52, %s1817_s28 }
 0x296   : > { %959 = vrot.lane.b32.xlu1 %v702_v48, %s1819_s30 }
 0x29a   : > { %957 = vrot.lane.b32.xlu1 %v701_v52, %s1819_s30 }
 0x29e   : > { %1089 = vrot.lane.b32.xlu1 %v701_v52, %s1818_s29 }
 0x30a   : > { %v767_v7 = vpop.xlane.xlu1 %766 }
 0x30b   : > { %1758 = vrcp.f32 %v767_v7 }
 0x30e   : > { %v770_v8 = vpop.xlane.xlu1 %769 }
 0x30f   : > { %1760 = vrcp.f32 %v770_v8 }
 0x312   : > { %v824_v9 = vpop.permute.xlu1 %823 }
 0x315   : > { %v1759_v12 = vpop.eup %1758 }
 0x316   : > { %v960_v11 = vpop.permute.xlu1 %959  ;;  %v773_v15 = vmul.f32 %v1759_v12, %v1755_v3 }
 0x317   : > { %v965_v13 = vsel %vm704_vm1, %v960_v11, 0 }
 0x318   : > { %1638 = vmatpush3.bf16.xpose.msra.mxu0 %v965_v13 }
 0x319   : > { %v1761_v14 = vpop.eup %1760  ;;  %1649 = vmatprep.subr.bf16.mxu0 %v1814_v2 }
 0x31a   : > { %v774_v16 = vmul.f32 %v1761_v14, %v1757_v5  ;;  %v958_v20 = vpop.permute.xlu1 %957 }
 0x31c   : > { %v775_v18 = vpack.c.bf16 %v774_v16, %v773_v15 }
 0x31e   : > { %1622 = vmatmul.mubr.msk.bf16.vlgmr.msra.gmra.mrb[8].mxu1 %vm752_vm2, %v775_v18  ;;  %v1090_v22 = vpop.permute.xlu1 %1089 }
 0x31f   : > { %1626 = vmatpush3.bf16.xpose.msra.mxu1 %v832_v19  ;;  %1640 = vmatmul.mubr.msk.bf16.vlgmr.msra.gmra.mrb[4].mxu0 %vm704_vm1, %v958_v20 }
 0x320   : > { %1650 = vmatpush3.bf16.xpose.msra.mxu0 %v1097_v21  ;;  %1627 = vmatprep.mubr.msk.bf16.mxu1 %vm1816_vm0, %v1814_v2 }
 0x321   : > { %1651 = vmatprep.mubr.msk.bf16.mxu0 %vm1816_vm0, %v1814_v2  ;;  %1631 = vmatprep.subr.bf16.mxu1 %v1814_v2 }
 0x322   : > { %1661 = vmatprep.subr.bf16.mxu0 %v1814_v2 }
 0x326   : > { %1628 = vmatmul.mubr.msk.bf16.vlgmr.msra.gmra.mrb[12].mxu1 %vm704_vm1, %v824_v9 }
 0x327   : > { %1652 = vmatmul.mubr.msk.bf16.vlgmr.msra.gmra.mrb[8].mxu0 %vm704_vm1, %v1090_v22  ;;  %1633 = vmatprep.mubr.msk.bf16.mxu1 %vm1816_vm0, %v1814_v2 }
 0x328   : > { %1677 = vmatprep.mubr.msk.bf16.mxu0 %vm1816_vm0, %v1814_v2 }
 0x3f1   : > { %v813_v23 = vpop.f32.mrb[8].mxu1 }
 0x3f2   : > { %820 = vst.msk [vmem:[#allocation2] sm:$0xff] %vm704_vm1, %v813_v23  ;;  %v1623_v24 = vpop.f32.mrb[9].mxu1  ;;  %v1001_v25 = vpop.f32.mrb[4].mxu0 }
 0x3f3   : > { %v816_v27 = vpop.f32.mrb[10].mxu1  ;;  %v1641_v28 = vpop.f32.mrb[5].mxu0  ;;  %v1008_v42 = vsel %vm752_vm2, %v1001_v25, -inf }
 0x3f4   : > { %821 = vst.msk [vmem:[#allocation2 + $0x8] sm:$0xff] %vm704_vm1, %v816_v27  ;;  %v1624_v29 = vpop.f32.mrb[11].mxu1  ;;  %v1004_v30 = vpop.f32.mrb[6].mxu0 }
 0x3f5   : > { %v1642_v31 = vpop.f32.mrb[7].mxu0  ;;  %v1011_v44 = vsel %vm752_vm2, %v1004_v30, -inf }
 0x3f9   : > { %v868_v32 = vpop.f32.mrb[12].mxu1 }
 0x3fa   : > { %v1629_v33 = vpop.f32.mrb[13].mxu1  ;;  %v1133_v34 = vpop.f32.mrb[8].mxu0  ;;  %v875_v35 = vsel %vm752_vm2, %v868_v32, -inf }
 0x3fb   : > { %876 = vmax.xlane.f32.xlu0 %v875_v35  ;;  %v871_v36 = vpop.f32.mrb[14].mxu1  ;;  %v1653_v37 = vpop.f32.mrb[9].mxu0  ;;  %v1140_v45 = vsel %vm752_vm2, %v1133_v34, -inf }
 0x3fc   : > { %v1630_v38 = vpop.f32.mrb[15].mxu1  ;;  %v1136_v39 = vpop.f32.mrb[10].mxu0  ;;  %v878_v40 = vsel %vm752_vm2, %v871_v36, -inf }
 0x3fd   : > { %879 = vmax.xlane.f32.xlu1 %v878_v40  ;;  %v1654_v41 = vpop.f32.mrb[11].mxu0  ;;  %v1143_v43 = vsel %vm752_vm2, %v1136_v39, -inf  ;;  %v1745_v38 = vld [vmem:[%s2137_s6] sm:$0xff]   ;;  %v1747_v40 = vld [vmem:[%s2137_s6 + $0x10] sm:$0xff]  }
 0x3fe   : > { %1662 = vmatpush3.bf16.msra.mxu0 %v1745_v38  ;;  %v1748_v41 = vld [vmem:[%s2137_s6 + $0x18] sm:$0xff]  }
 0x3ff   : > { %1009 = vmax.xlane.f32.xlu0 %v1008_v42  ;;  %1663 = vmatprep.subr.bf16.mxu0 %v1814_v2  ;;  %v1749_v42 = vld [vmem:[%s2137_s6 + $0x20] sm:$0xff]  }
 0x401   : > { %1144 = vmax.xlane.f32.xlu1 %v1143_v43 }
 0x403   : > { %1012 = vmax.xlane.f32.xlu0 %v1011_v44 }
 0x407   : > { %1141 = vmax.xlane.f32.xlu0 %v1140_v45 }
 0x488   : > { %v877_v46 = vpop.xlane.xlu0 %876 }
 0x489   : > { %v881_v56 = vsub.f32 %v868_v32, %v877_v46 }
 0x48a   : > { %v880_v47 = vpop.xlane.xlu1 %879 }
 0x48b   : > { %v882_v57 = vsub.f32 %v871_v36, %v880_v47  ;;  %v883_v62 = vmul.f32 1.442695, %v881_v56  ;;  %v1750_v47 = vld [vmem:[%s2137_s6 + $0x28] sm:$0xff]  }
 0x48c   : > { %v1010_v48 = vpop.xlane.xlu0 %1009 }
 0x48d   : > { %v1014_v49 = vsub.f32 %v1001_v25, %v1010_v48  ;;  %v885_v63 = vmul.f32 1.442695, %v882_v57  ;;  %v1751_v48 = vld [vmem:[%s2137_s6 + $0x30] sm:$0xff]  }
 0x48e   : > { %v1145_v50 = vpop.xlane.xlu1 %1144 }
 0x48f   : > { %v1016_v52 = vmul.f32 1.442695, %v1014_v49  ;;  %v1147_v53 = vsub.f32 %v1136_v39, %v1145_v50  ;;  %v1746_v39 = vld [vmem:[%s2137_s6 + $0x8] sm:$0xff]  }
 0x490   : > { %v1013_v54 = vpop.xlane.xlu0 %1012  ;;  %1664 = vmatpush3.bf16.msra.mxu0 %v1746_v39 }
 0x491   : > { %1762 = vpow2.f32 %v1016_v52  ;;  %v1015_v55 = vsub.f32 %v1004_v30, %v1013_v54  ;;  %v1150_v58 = vmul.f32 1.442695, %v1147_v53  ;;  %1665 = vmatprep.subr.bf16.mxu0 %v1814_v2  ;;  %v1752_v53 = vld [vmem:[%s2137_s6 + $0x38] sm:$0xff]  }
 0x493   : > { %v1018_v59 = vmul.f32 1.442695, %v1015_v55 }
 0x494   : > { %v1142_v60 = vpop.xlane.xlu0 %1141  ;;  %1666 = vmatpush3.bf16.msra.mxu0 %v1747_v40 }
 0x495   : > { %1764 = vpow2.f32 %v1018_v59  ;;  %v1146_v61 = vsub.f32 %v1133_v34, %v1142_v60  ;;  %1667 = vmatprep.subr.bf16.mxu0 %v1814_v2 }
 0x496   : > { %1766 = vpow2.f32 %v1150_v58 }
 0x497   : > { %v1148_v0 = vmul.f32 1.442695, %v1146_v61 }
 0x498   : > { %1668 = vmatpush3.bf16.msra.mxu0 %v1748_v41 }
 0x499   : > { %1768 = vpow2.f32 %v1148_v0  ;;  %1669 = vmatprep.subr.bf16.mxu0 %v1814_v2 }
 0x49a   : > { %1770 = vpow2.f32 %v883_v62 }
 0x49b   : > { %v1763_v1 = vpop.eup %1762  ;;  %1772 = vpow2.f32 %v885_v63 }
 0x49c   : > { %v1020_v3 = vsel %vm752_vm2, %v1763_v1, 0.0  ;;  %1670 = vmatpush3.bf16.msra.mxu0 %v1749_v42 }
 0x49d   : > { %1021 = vadd.xlane.f32.xlu0 %v1020_v3  ;;  %1671 = vmatprep.subr.bf16.mxu0 %v1814_v2 }
 0x49f   : > { %v1765_v4 = vpop.eup %1764 }
 0x4a0   : > { %v1023_v5 = vsel %vm752_vm2, %v1765_v4, 0.0  ;;  %v1767_v6 = vpop.eup %1766  ;;  %1672 = vmatpush3.bf16.msra.mxu0 %v1750_v47 }
 0x4a1   : > { %1024 = vadd.xlane.f32.xlu1 %v1023_v5  ;;  %v1155_v10 = vsel %vm752_vm2, %v1767_v6, 0.0  ;;  %1673 = vmatprep.subr.bf16.mxu0 %v1814_v2  ;;  %v422_v5 = vunpack.c.l.bf16 %v1988_v26 }
 0x4a3   : > { %v1769_v7 = vpop.eup %1768 }
 0x4a4   : > { %v1771_v8 = vpop.eup %1770  ;;  %v1152_v9 = vsel %vm752_vm2, %v1769_v7, 0.0  ;;  %1674 = vmatpush3.bf16.msra.mxu0 %v1751_v48 }
 0x4a5   : > { %v1773_v11 = vpop.eup %1772  ;;  %1153 = vadd.xlane.f32.xlu0 %v1152_v9  ;;  %1156 = vadd.xlane.f32.xlu1 %v1155_v10  ;;  %v887_v12 = vsel %vm752_vm2, %v1771_v8, 0.0  ;;  %v423_v9 = vunpack.c.h.bf16 %v1988_v26 }
 0x4a6   : > { %v890_v13 = vsel %vm752_vm2, %v1773_v11, 0.0  ;;  %1675 = vmatprep.subr.bf16.mxu0 %v1814_v2 }
 0x4a8   : > { %1676 = vmatpush3.bf16.msra.mxu0 %v1752_v53 }
 0x4a9   : > { %888 = vadd.xlane.f32.xlu0 %v887_v12  ;;  %891 = vadd.xlane.f32.xlu1 %v890_v13 }
 0x4ba   : > { %1031 = vrot.lane.b32.xlu1 %v2004_v51, %s1819_s30 }
 0x4be   : > { %1163 = vrot.lane.b32.xlu1 %v2004_v51, %s1818_s29 }
 0x4bf   : > { %899 = vrot.lane.b32.xlu0 %v2004_v51, %s1817_s28 }
 0x52a   : > { %v1022_v14 = vpop.xlane.xlu0 %1021 }
 0x52e   : > { %v1025_v15 = vpop.xlane.xlu1 %1024 }
 0x532   : > { %v1154_v16 = vpop.xlane.xlu0 %1153  ;;  %v1157_v17 = vpop.xlane.xlu1 %1156 }
 0x536   : > { %v889_v18 = vpop.xlane.xlu0 %888  ;;  %v892_v19 = vpop.xlane.xlu1 %891 }
 0x537   : > { %1774 = vrcp.f32 %v889_v18 }
 0x538   : > { %1776 = vrcp.f32 %v892_v19 }
 0x539   : > { %1778 = vrcp.f32 %v1025_v15 }
 0x53a   : > { %v900_v20 = vpop.permute.xlu0 %899  ;;  %1780 = vrcp.f32 %v1022_v14  ;;  %v1032_v27 = vpop.permute.xlu1 %1031 }
 0x53b   : > { %1632 = vmatpush3.bf16.msra.mxu1 %v900_v20  ;;  %1782 = vrcp.f32 %v1154_v16 }
 0x53c   : > { %1643 = vmatprep.subr.bf16.mxu1 %v1814_v2  ;;  %1784 = vrcp.f32 %v1157_v17 }
 0x53e   : > { %v1164_v34 = vpop.permute.xlu1 %1163 }
 0x541   : > { %v1775_v21 = vpop.eup %1774 }
 0x542   : > { %v1777_v22 = vpop.eup %1776  ;;  %v895_v23 = vmul.f32 %v1775_v21, %v1771_v8 }
 0x543   : > { %v896_v24 = vmul.f32 %v1777_v22, %v1773_v11  ;;  %v1779_v25 = vpop.eup %1778 }
 0x544   : > { %v1781_v28 = vpop.eup %1780  ;;  %v1029_v29 = vmul.f32 %v1779_v25, %v1765_v4  ;;  %v1534_v4 = vld [vmem:[%s2138_s7] ss:$0 sm:$0xff] }
 0x545   : > { %v897_v51 = vpack.c.bf16 %v896_v24, %v895_v23  ;;  %v1028_v30 = vmul.f32 %v1781_v28, %v1763_v1  ;;  %v1783_v31 = vpop.eup %1782 }
 0x546   : > { %v1785_v33 = vpop.eup %1784  ;;  %v1160_v35 = vmul.f32 %v1783_v31, %v1769_v7 }
 0x547   : > { %1634 = vmatmul.mubr.msk.bf16.vlgmr.msra.gmra.mrb[16].mxu1 %vm752_vm2, %v897_v51  ;;  %v1030_v32 = vpack.c.bf16 %v1029_v29, %v1028_v30  ;;  %v1161_v36 = vmul.f32 %v1785_v33, %v1767_v6  ;;  %v1543_v30 = vld [vmem:[%s2139_s8] ss:$0 sm:$0xff] }
 0x548   : > { %1644 = vmatpush3.bf16.msra.mxu1 %v1032_v27  ;;  %1645 = vmatprep.mubr.msk.bf16.mxu1 %vm1816_vm0, %v1814_v2 }
 0x549   : > { %1655 = vmatprep.subr.bf16.mxu1 %v1814_v2  ;;  %v1162_v37 = vpack.c.bf16 %v1161_v36, %v1160_v35 }
 0x54f   : > { %1646 = vmatmul.mubr.msk.bf16.vlgmr.msra.gmra.mrb[20].mxu1 %vm752_vm2, %v1030_v32 }
 0x550   : > { %1656 = vmatpush3.bf16.msra.mxu1 %v1164_v34  ;;  %1657 = vmatprep.mubr.msk.bf16.mxu1 %vm1816_vm0, %v1814_v2  ;;  %v1544_v34 = vld [vmem:[%s2140_s9] ss:$0 sm:$0xff] }
 0x557   : > { %1658 = vmatmul.mubr.msk.bf16.vlgmr.msra.gmra.mrb[24].mxu1 %vm752_vm2, %v1162_v37 }
 0x61a   : > { %v939_v43 = vpop.f32.mrb[16].mxu1 }
 0x61b   : > { %948 = vrot.lane.b32.xlu1 %v939_v43, %s1818_s29  ;;  %v1635_v44 = vpop.f32.mrb[17].mxu1 }
 0x61c   : > { %v942_v45 = vpop.f32.mrb[18].mxu1 }
 0x61d   : > { %950 = vrot.lane.b32.xlu0 %v942_v45, %s1818_s29  ;;  %v1636_v46 = vpop.f32.mrb[19].mxu1 }
 0x622   : > { %v1071_v49 = vpop.f32.mrb[20].mxu1 }
 0x623   : > { %1080 = vrot.lane.b32.xlu1 %v1071_v49, %s1819_s30  ;;  %v1647_v50 = vpop.f32.mrb[21].mxu1 }
 0x624   : > { %v1074_v52 = vpop.f32.mrb[22].mxu1 }
 0x625   : > { %1082 = vrot.lane.b32.xlu0 %v1074_v52, %s1819_s30  ;;  %v1648_v54 = vpop.f32.mrb[23].mxu1 }
 0x62a   : > { %v1203_v55 = vpop.f32.mrb[24].mxu1 }
 0x62b   : > { %1212 = vrot.lane.b32.xlu1 %v1203_v55, %s1817_s28  ;;  %v1659_v56 = vpop.f32.mrb[25].mxu1 }
 0x62c   : > { %v1206_v57 = vpop.f32.mrb[26].mxu1 }
 0x62d   : > { %1214 = vrot.lane.b32.xlu0 %v1206_v57, %s1817_s28  ;;  %v1660_v58 = vpop.f32.mrb[27].mxu1 }
 0x68d   : > { %v949_v59 = vpop.permute.xlu1 %948 }
 0x68e   : > { %955 = vst.msk [vmem:[#allocation2] sm:$0xff] %vm954_vm3, %v949_v59 }
 0x68f   : > { %v951_v60 = vpop.permute.xlu0 %950 }
 0x690   : > { %956 = vst.msk [vmem:[#allocation2 + $0x8] sm:$0xff] %vm954_vm3, %v951_v60 }
 0x695   : > { %v1081_v61 = vpop.permute.xlu1 %1080 }
 0x696   : > { %1087 = vst.msk [vmem:[#allocation2] sm:$0xff] %vm1086_vm4, %v1081_v61 }
 0x697   : > { %v1083_v62 = vpop.permute.xlu0 %1082 }
 0x698   : > { %1088 = vst.msk [vmem:[#allocation2 + $0x8] sm:$0xff] %vm1086_vm4, %v1083_v62 }
 0x69d   : > { %v1213_v2 = vpop.permute.xlu1 %1212 }
 0x69e   : > { %1219 = vst.msk [vmem:[#allocation2] sm:$0xff] %vm1218_vm5, %v1213_v2 }
 0x69f   : > { %v1215_v63 = vpop.permute.xlu0 %1214 }
 0x6a0   : > { %1220 = vst.msk [vmem:[#allocation2 + $0x8] sm:$0xff] %vm1218_vm5, %v1215_v63 }
 0x6a5   : > { %v1221_v0 = vld [vmem:[#allocation2] sm:$0xff] }
 0x6a7   : > { %v1222_v1 = vld [vmem:[#allocation2 + $0x8] sm:$0xff] }
 0x6a8   : > { %v1223_v3 = vpack.c.bf16 %v1222_v1, %v1221_v0 }
 0x6aa   : > { %1678 = vmatmul.mubr.bf16.vlgmr.msra.gmra.mrb[12].mxu0 %v1223_v3 }
 0x77d   : > { %v1329_v6 = vpop.f32.mrb[12].mxu0 }
 0x77e   : > { %v1330_v7 = vadd.f32 %v1534_v4, %v1329_v6  ;;  %v1679_v8 = vpop.f32.mrb[13].mxu0 }
 0x77f   : > { %v1332_v10 = vpop.f32.mrb[14].mxu0 }
 0x780   : > { %v1333_v11 = vadd.f32 %v1534_v4, %v1332_v10  ;;  %v1680_v12 = vpop.f32.mrb[15].mxu0  ;;  %v1336_v13 = vadd.f32 %v1330_v7, %v422_v5 }
 0x782   : > { %1340 = vadd.xlane.f32.xlu1 %v1336_v13  ;;  %v1337_v14 = vadd.f32 %v1333_v11, %v423_v9 }
 0x784   : > { %1342 = vadd.xlane.f32.xlu0 %v1337_v14 }
 0x80f   : > { %v1341_v15 = vpop.xlane.xlu1 %1340 }
 0x810   : > { %v1345_v16 = vmul.f32 0.0078125, %v1341_v15 }
 0x811   : > { %v1343_v17 = vpop.xlane.xlu0 %1342 }
 0x812   : > { %v1347_v18 = vsub.f32 %v1336_v13, %v1345_v16  ;;  %v1346_v19 = vmul.f32 0.0078125, %v1343_v17 }
 0x814   : > { %v1348_v20 = vsub.f32 %v1337_v14, %v1346_v19  ;;  %v1349_v21 = vmul.f32 %v1347_v18, %v1347_v18 }
 0x816   : > { %1351 = vadd.xlane.f32.xlu0 %v1349_v21  ;;  %v1350_v22 = vmul.f32 %v1348_v20, %v1348_v20 }
 0x81a   : > { %1353 = vadd.xlane.f32.xlu0 %v1350_v22 }
 0x8a3   : > { %v1352_v23 = vpop.xlane.xlu0 %1351 }
 0x8a4   : > { %v1355_v24 = vmul.f32 0.0078125, %v1352_v23 }
 0x8a6   : > { %v1357_v26 = vadd.f32 1e-06, %v1355_v24 }
 0x8a7   : > { %v1354_v51 = vpop.xlane.xlu0 %1353 }
 0x8a8   : > { %1786 = vrsqrt.f32 %v1357_v26  ;;  %v1356_v25 = vmul.f32 0.0078125, %v1354_v51 }
 0x8aa   : > { %v1358_v27 = vadd.f32 1e-06, %v1356_v25 }
 0x8ac   : > { %1788 = vrsqrt.f32 %v1358_v27 }
 0x8b2   : > { %v1787_v28 = vpop.eup %1786 }
 0x8b3   : > { %v1361_v29 = vmul.f32 %v1787_v28, %v1347_v18 }
 0x8b5   : > { %v1369_v32 = vmul.f32 %v1543_v30, %v1361_v29 }
 0x8b6   : > { %v1789_v31 = vpop.eup %1788 }
 0x8b7   : > { %v1362_v33 = vmul.f32 %v1789_v31, %v1348_v20  ;;  %v1377_v36 = vadd.f32 %v1544_v34, %v1369_v32 }
 0x8b9   : > { %v1370_v35 = vmul.f32 %v1543_v30, %v1362_v33 }
 0x8bb   : > { %v1378_v37 = vadd.f32 %v1544_v34, %v1370_v35 }
 0x8bd   : > { %v1557_v38 = vpack.c.bf16 %v1378_v37, %v1377_v36 }
 0x8bf   : > { %1558 = vst [vmem:[%s417_s23] sm:$0xff] %v1557_v38  }
 0x8c0 PF: > { %s20_s15 = sadd.s32 1, %s1812_s15   ;;  %s2142_s13 = smov %s1808_s14 }
 0x8c1   : > { %p17_p5 = scmp.ge.s32.totalorder %s20_s15, 4   ;;  %s2143_s14 = smov %s2145_s16 }
 0x8c3   :  { %19 = sbr.rel (!%p17_p5) target bundleno = 2 (0x2), region = 93 }

// kernel: transformer_decoder.3
= control target key start
LH: loop header
LB: loop body
LE: loop exit
PB: predicated region body
PF: predicated region fallthrough
CT: control target
= control target key end

     0   :  { %15 = vsyncpa [#allocation4], 0  ;;  %s2342_s0 = inlined_call_operand.vmem [shape: bf16[2,16,128], index: 0, kind: input, shape index: {}, may-alias: {0,1}]   ;;  %s2343_s1 = inlined_call_operand.vmem [shape: bf16[2,16,128], index: 1, kind: input, shape index: {}, may-alias: {0,1}]   ;;  %s2344_s2 = inlined_call_operand.vmem [shape: bf16[128,128], index: 2, kind: input, shape index: {}]   ;;  %s2345_s3 = inlined_call_operand.vmem [shape: f32[1,128], index: 3, kind: input, shape index: {}]   ;;  %s2346_s4 = inlined_call_operand.hbm [shape: bf16[128,256], index: 4, kind: input, shape index: {}]   ;;  %s2347_s5 = inlined_call_operand.vmem [shape: f32[1,256], index: 5, kind: input, shape index: {}]   ;;  %s2348_s6 = inlined_call_operand.hbm [shape: bf16[128,128], index: 6, kind: input, shape index: {}]   ;;  %s2349_s7 = inlined_call_operand.vmem [shape: f32[1,128], index: 7, kind: input, shape index: {}]   ;;  %s2350_s8 = inlined_call_operand.vmem [shape: f32[1,128], index: 8, kind: input, shape index: {}]   ;;  %s2351_s9 = inlined_call_operand.vmem [shape: f32[1,128], index: 9, kind: input, shape index: {}]   ;;  %s2352_s10 = inlined_call_operand.vmem [shape: bf16[2,16,128], index: 10, kind: output, shape index: {}]  }
   0x1   :  { %16 = vsyncpa [#allocation6], 0  ;;  %s2045_s13 = smov 0   ;;  %s2047_s14 = smov 0  }
   0x2   :  { %s2049_s15 = smov 0  }
   0x3 LB: > { %s1559_s16 = sadd.s32 4294967295, %s1976_s15   ;;  %s34_s17 = sadd.s32 1, %s1972_s14  ;;  %s1976_s15 = sphi %s2049_s15, %s22_s15   ;;  %s1972_s14 = sphi %s2047_s14, %s2362_s14   ;;  %s1968_s13 = sphi %s2045_s13, %s2361_s13  }
   0x4   : > { %p36_p0 = scmp.ge.s32.totalorder %s34_s17, 2  ;;  %p1561_p1 = scmp.ge.s32.totalorder %s1976_s15, 1 }
   0x5   : > { %p289_p2 = scmp.lt.s32.totalorder %s1976_s15, 3  ;;  %p2070_p4 = scmp.eq.s32.totalorder %s1559_s16, 0 }
   0x6   : > { %s2364_s17 = smov (%p36_p0, %s34_s17), 0  ;;  %s1978_s20 = smov [#allocation3]  }
   0x7   : > { %p2066_p3 = pnand %p1561_p1, %p289_p2  ;;  %s307_s21 = sshll.u32 %s1978_s20, 4  ;;  %s308_s21 = int_to_ptr.vmem [resolvable:$true] %s307_s21 }
   0x8   : > { %s2357_s19 = scalar_select %p2070_p4, 1, 0 }
   0x9   : > { %s2356_s18 = scalar_select %p2066_p3, 1, 0 }
   0xa   : > { %p1764_p5 = pneg %p2066_p3  ;;  %s1979_s23 = smov [#allocation5]  }
   0xb   : > { %s323_s24 = sshll.u32 %s1979_s23, 4  ;;  %s1890_s27 = scalar_lea.hbm %s2346_s4, 2048  ;;  %s2082_s24 = int_to_ptr.vmem [resolvable:$true] %s323_s24 }
   0xc   : > { %p2078_p6 = pnand %p2070_p4, %p1764_p5  ;;  %p1891_p7 = scmp.ne.s32.totalorder %s2346_s4, %s1890_s27 }
   0xd   : > { %p1897_p11 = scmp.lt.u32.totalorder %s1890_s27, %s2346_s4 }
   0xe   : > { %p1892_p8 = pneg %p2078_p6 }
  0x10   : > { %p1893_p9 = pnand %p1892_p8, %p1891_p7 }
  0x12   : > { %p1894_p10 = pneg %p1893_p9 }
  0x14   : > { %p1899_p12 = pnand %p1897_p11, %p1894_p10 }
  0x16   : > { %1902 = shalt.err (!%p1899_p12)
}
  0x17   : > { %s1903_s12 = scalar_lea.vmem %s308_s21, 2048  ;;  %p1911_p2 = scmp.lt.s32.totalorder %s308_s21, %s308_s21 }
  0x18   : > { %p1904_p13 = scmp.ne.s32.totalorder %s308_s21, %s1903_s12  ;;  %p1912_p5 = scmp.lt.s32.totalorder %s1903_s12, %s1903_s12 }
  0x1a   : > { %p1906_p0 = pnand %p1904_p13, %p1892_p8  ;;  %p1913_p4 = por %p1912_p5, %p1911_p2 }
  0x1c   : > { %p1907_p1 = pneg %p1906_p0 }
  0x1e   : > { %p1914_p3 = pnand %p1913_p4, %p1907_p1 }
  0x20   : > { %1917 = shalt.err (!%p1914_p3)
}
  0x21   : > { %s1980_s16 = smov 128   ;;  %s1981_s20 = smov 8  }
  0x22   : > { %1767 = dma.hbm_to_vmem [thread:$0]  (!%p2078_p6), %s2346_s4, 2048, %s308_s21, [#allocation4], %s1980_s16, %s1980_s16, %s1981_s20  }
  0x23   : > { %s1918_s28 = scalar_lea.hbm %s2348_s6, 1024 }
  0x24   : > { %p1919_p7 = scmp.ne.s32.totalorder %s2348_s6, %s1918_s28  ;;  %p1925_p9 = scmp.lt.u32.totalorder %s1918_s28, %s2348_s6 }
  0x26   : > { %p1921_p3 = pnand %p1919_p7, %p1892_p8 }
  0x28   : > { %p1922_p4 = pneg %p1921_p3 }
  0x2a   : > { %p1927_p10 = pnand %p1925_p9, %p1922_p4 }
  0x2c   : > { %1930 = shalt.err (!%p1927_p10)
}
  0x2d   : > { %s1931_s21 = scalar_lea.vmem %s2082_s24, 1024  ;;  %p1939_p0 = scmp.lt.s32.totalorder %s2082_s24, %s2082_s24 }
  0x2e   : > { %p1932_p11 = scmp.ne.s32.totalorder %s2082_s24, %s1931_s21  ;;  %p1940_p1 = scmp.lt.s32.totalorder %s1931_s21, %s1931_s21 }
  0x30   : > { %p1934_p12 = pnand %p1932_p11, %p1892_p8  ;;  %p1941_p2 = por %p1940_p1, %p1939_p0 }
  0x32   : > { %p1935_p13 = pneg %p1934_p12 }
  0x34   : > { %p1942_p5 = pnand %p1941_p2, %p1935_p13 }
  0x36   : > { %1945 = shalt.err (!%p1942_p5)
}
  0x37   : > { %s1982_s16 = smov 64   ;;  %s1983_s20 = smov 4  }
  0x38   : > { %1770 = dma.hbm_to_vmem [thread:$0]  (!%p2078_p6), %s2348_s6, 1024, %s2082_s24, [#allocation6], %s1982_s16, %s1982_s16, %s1983_s20  }
  0x39   : > { %p2359_p7 = scmp.ne.s32.totalorder %s2356_s18, 0 }
  0x3a   : > { %p2360_p8 = scmp.ne.s32.totalorder (!%p2359_p7), %s2357_s19, 0 }
  0x3b   : > { %369 = sbr.rel (%p2359_p7) target bundleno = 2305 (0x901), region = 60 }
  0x42   : > { %1959 = dma.done.wait (%p2360_p8), [#allocation4], 2048  }
  0x43   : > { %1961 = vsyncadd (%p2360_p8), [#allocation4], 4294965248 }
  0x44   : > { %1963 = dma.done.wait (%p2360_p8), [#allocation6], 1024  }
  0x45   : > { %1965 = vsyncadd (%p2360_p8), [#allocation6], 4294966272  ;;  %v1984_v0 = vmov 0.0   ;;  %v1985_v1 = vmov 0   ;;  %vm1986_vm0 = vmmov 0   ;;  %v1817_v6 = vld [vmem:[%s2344_s2] sm:$0xff]   ;;  %v592_v28 = vlaneseq }
  0x46   : > { %1668 = vmatprep.subr.bf16.mxu0 %v1984_v0  ;;  %720 = vmatprep.mubr.bf16.mxu1 %v1985_v1  ;;  %v1811_v2 = vld [vmem:[#allocation3 + $0x4] ss:$8 sps:$4 sm:$0xff]   ;;  %v1813_v3 = vld [vmem:[#allocation3] ss:$8 sps:$4 sm:$0xff]   ;;  %v1814_v4 = vld [vmem:[#allocation3 + $0x14] ss:$8 sps:$4 sm:$0xff]  }
  0x47   : > { %1684 = vmatprep.mubr.msk.bf16.mxu0 %vm1986_vm0, %v1984_v0  ;;  %688 = vmatprep.subr.bf16.mxu1 %v1811_v2  ;;  %v1816_v5 = vld [vmem:[#allocation3 + $0x10] ss:$8 sps:$4 sm:$0xff]   ;;  %v1818_v7 = vld [vmem:[#allocation3 + $0x24] ss:$8 sps:$4 sm:$0xff]   ;;  %p425_p6 = scmp.lt.s32.totalorder %s1968_s13, 1  ;;  %v2196_v29 = vshrl.u32 %v592_v28, 7 }
  0x48   : > { %689 = vmatpush1.bf16.msra.mxu1 %v1813_v3  ;;  %1669 = vmatpush3.bf16.msra.mxu0 %v1817_v6  ;;  %v1821_v8 = vld [vmem:[%s2344_s2 + $0x8] sm:$0xff]   ;;  %v1820_v9 = vld [vmem:[#allocation3 + $0x20] ss:$8 sps:$4 sm:$0xff]   ;;  %v1826_v13 = vld [vmem:[#allocation3 + $0x44] ss:$8 sps:$4 sm:$0xff]   ;;  %vm745_vm1 = vcmask 261120  }
  0x49   : > { %690 = vmatprep.subr.bf16.mxu1 %v1814_v4  ;;  %1670 = vmatprep.subr.bf16.mxu0 %v1984_v0  ;;  %v1822_v10 = vld [vmem:[#allocation3 + $0x34] ss:$8 sps:$4 sm:$0xff]   ;;  %v1825_v11 = vld [vmem:[%s2344_s2 + $0x10] sm:$0xff]   ;;  %s2366_s13 = smov (!%p425_p6, %s1968_s13), 1  ;;  %v1824_v12 = vld [vmem:[#allocation3 + $0x30] ss:$8 sps:$4 sm:$0xff]  }
  0x4a   : > { %v1829_v14 = vld [vmem:[%s2344_s2 + $0x18] sm:$0xff]   ;;  %s2160_s30 = sshll.u32 %s2366_s13, 3  ;;  %v1830_v16 = vld [vmem:[#allocation3 + $0x54] ss:$8 sps:$4 sm:$0xff]   ;;  %v1832_v18 = vld [vmem:[#allocation3 + $0x50] ss:$8 sps:$4 sm:$0xff]  }
  0x4b   : > { %v1828_v15 = vld [vmem:[#allocation3 + $0x40] ss:$8 sps:$4 sm:$0xff]   ;;  %s438_s21 = scalar_lea.vmem %s2343_s1, %s2160_s30  ;;  %v1833_v17 = vld [vmem:[%s2344_s2 + $0x20] sm:$0xff]   ;;  %v1834_v19 = vld [vmem:[#allocation3 + $0x64] ss:$8 sps:$4 sm:$0xff]   ;;  %s432_s24 = scalar_lea.vmem %s2342_s0, %s2160_s30  ;;  %v594_v30 = vsub.s32 0, %v2196_v29 }
  0x4c   : > { %691 = vmatpush1.bf16.msra.mxu1 %v1816_v5  ;;  %1671 = vmatpush3.bf16.msra.mxu0 %v1821_v8  ;;  %v1837_v20 = vld [vmem:[%s2344_s2 + $0x28] sm:$0xff]   ;;  %v1836_v21 = vld [vmem:[#allocation3 + $0x60] ss:$8 sps:$4 sm:$0xff]   ;;  %v2186_v26 = vld [vmem:[%s432_s24] sm:$0xff]   ;;  %v598_v32 = vsub.s32 1, %v2196_v29  ;;  %v2215_v54 = vand.u32 127, %v592_v28  ;;  %s447_s27 = scalar_lea.vmem %s2352_s10, %s2160_s30 }
  0x4d   : > { %692 = vmatprep.subr.bf16.mxu1 %v1818_v7  ;;  %1672 = vmatprep.subr.bf16.mxu0 %v1984_v0  ;;  %v1838_v22 = vld [vmem:[#allocation3 + $0x74] ss:$8 sps:$4 sm:$0xff]   ;;  %v1841_v23 = vld [vmem:[%s2344_s2 + $0x30] sm:$0xff]   ;;  %v1840_v24 = vld [vmem:[#allocation3 + $0x70] ss:$8 sps:$4 sm:$0xff]   ;;  %v2218_v55 = vadd.s32 8, %v2196_v29 }
  0x4e   : > { %v1843_v25 = vld [vmem:[%s2344_s2 + $0x38] sm:$0xff]   ;;  %v1842_v27 = vld [vmem:[%s438_s21] sm:$0xff]   ;;  %vm743_vm2 = vcmp.ge.s32.totalorder %v2196_v29, %v2215_v54  ;;  %vm795_vm3 = vcmask 130048   ;;  %s1987_s21 = smov 96   ;;  %s1988_s16 = smov 32   ;;  %vm999_vm5 = vcmask 523520  }
  0x4f   : > { %v590_v31 = vld [vmem:[%s2347_s5] sm:$0x3]  ;;  %vm744_vm4 = vcmp.ge.s32.totalorder %v2218_v55, %v2215_v54  ;;  %s1989_s20 = smov 64   ;;  %vm1133_vm6 = vcmask 785920   ;;  %vm1267_vm7 = vcmask 1048320  }
  0x50   : > { %693 = vmatpush1.bf16.msra.mxu1 %v1820_v9  ;;  %1673 = vmatpush3.bf16.msra.mxu0 %v1825_v11  ;;  %v595_v33 = vrot.slane %v590_v31, %v594_v30  ;;  %v599_v35 = vrot.slane %v590_v31, %v598_v32  ;;  %v1574_v36 = vld [vmem:[%s2345_s3] ss:$0 sm:$0xff] }
  0x51   : > { %694 = vmatprep.subr.bf16.mxu1 %v1822_v10  ;;  %1674 = vmatprep.subr.bf16.mxu0 %v1984_v0 }
  0x54   : > { %695 = vmatpush1.bf16.msra.mxu1 %v1824_v12  ;;  %1675 = vmatpush3.bf16.msra.mxu0 %v1829_v14 }
  0x55   : > { %696 = vmatprep.subr.bf16.mxu1 %v1826_v13  ;;  %1676 = vmatprep.subr.bf16.mxu0 %v1984_v0 }
  0x58   : > { %697 = vmatpush1.bf16.msra.mxu1 %v1828_v15  ;;  %1677 = vmatpush3.bf16.msra.mxu0 %v1833_v17 }
  0x59   : > { %698 = vmatprep.subr.bf16.mxu1 %v1830_v16  ;;  %1678 = vmatprep.subr.bf16.mxu0 %v1984_v0 }
  0x5c   : > { %699 = vmatpush1.bf16.msra.mxu1 %v1832_v18  ;;  %1679 = vmatpush3.bf16.msra.mxu0 %v1837_v20 }
  0x5d   : > { %700 = vmatprep.subr.bf16.mxu1 %v1834_v19  ;;  %1680 = vmatprep.subr.bf16.mxu0 %v1984_v0 }
  0x60   : > { %701 = vmatpush1.bf16.msra.mxu1 %v1836_v21  ;;  %1681 = vmatpush3.bf16.msra.mxu0 %v1841_v23 }
  0x61   : > { %702 = vmatprep.subr.bf16.mxu1 %v1838_v22  ;;  %1682 = vmatprep.subr.bf16.mxu0 %v1984_v0 }
  0x64   : > { %703 = vmatpush1.bf16.msra.mxu1 %v1840_v24  ;;  %1683 = vmatpush3.bf16.msra.mxu0 %v1843_v25 }
  0x65   : > { %1688 = vmatprep.subr.bf16.mxu1 %v1984_v0  ;;  %1712 = vmatprep.subr.bf16.mxu0 %v1984_v0 }
  0x67   : > { %721 = vmatmul.mubr.bf16.vlgmr.msra.gmra.mrb[0].mxu1 %v1842_v27  ;;  %1685 = vmatmul.mubr.bf16.vlgmr.msra.gmra.mrb[0].mxu0 %v2186_v26 }
  0x68   : > { %1690 = vmatprep.mubr.msk.bf16.mxu1 %vm1986_vm0, %v1984_v0  ;;  %1714 = vmatprep.mubr.msk.bf16.mxu0 %vm1986_vm0, %v1984_v0 }
 0x13a   : > { %v722_v34 = vpop.f32.mrb[0].mxu1  ;;  %v567_v39 = vpop.f32.mrb[0].mxu0 }
 0x13b   : > { %v724_v37 = vpop.f32.mrb[1].mxu1  ;;  %v723_v40 = vadd.f32 %v722_v34, %v595_v33  ;;  %v568_v43 = vadd.f32 %v1574_v36, %v567_v39  ;;  %v1686_v44 = vpop.f32.mrb[1].mxu0 }
 0x13c   : > { %v726_v38 = vpop.f32.mrb[2].mxu1  ;;  %v725_v45 = vadd.f32 %v724_v37, %v599_v35  ;;  %v570_v47 = vpop.f32.mrb[2].mxu0 }
 0x13d   : > { %v727_v41 = vadd.f32 %v726_v38, %v595_v33  ;;  %v728_v42 = vpop.f32.mrb[3].mxu1  ;;  %v571_v49 = vadd.f32 %v1574_v36, %v570_v47  ;;  %v1687_v50 = vpop.f32.mrb[3].mxu0 }
 0x13e   : > { %v729_v46 = vadd.f32 %v728_v42, %v599_v35 }
 0x13f   : > { %v732_v48 = vpack.c.bf16 %v727_v41, %v723_v40  ;;  %v731_v52 = vpack.c.bf16 %v571_v49, %v568_v43 }
 0x140   : > { %v2206_v51 = vpack.c.bf16 %v729_v46, %v725_v45 }
 0x141   : > { %v750_v53 = vsel %vm745_vm1, %v732_v48, 0 }
 0x142   : > { %1689 = vmatpush3.bf16.xpose.msra.mxu1 %v750_v53 }
 0x143   : > { %1694 = vmatprep.subr.bf16.mxu1 %v1984_v0 }
 0x149   : > { %1691 = vmatmul.mubr.msk.bf16.vlgmr.msra.gmra.mrb[4].mxu1 %vm745_vm1, %v731_v52 }
 0x14a   : > { %1695 = vmatpush3.bf16.msra.mxu1 %v2206_v51  ;;  %1696 = vmatprep.mubr.msk.bf16.mxu1 %vm1986_vm0, %v1984_v0 }
 0x14b   : > { %1700 = vmatprep.subr.bf16.mxu1 %v1984_v0 }
 0x21c   : > { %v786_v56 = vpop.f32.mrb[4].mxu1 }
 0x21d   : > { %v793_v57 = vsel %vm743_vm2, %v786_v56, -1e+09  ;;  %v1692_v58 = vpop.f32.mrb[5].mxu1 }
 0x21e   : > { %v789_v59 = vpop.f32.mrb[6].mxu1  ;;  %v796_v60 = vsel %vm795_vm3, %v793_v57, -inf }
 0x21f   : > { %v794_v61 = vsel %vm744_vm4, %v789_v59, -1e+09  ;;  %797 = vmax.xlane.f32.xlu0 %v796_v60  ;;  %v1693_v62 = vpop.f32.mrb[7].mxu1 }
 0x220   : > { %v799_v63 = vsel %vm795_vm3, %v794_v61, -inf }
 0x223   : > { %800 = vmax.xlane.f32.xlu0 %v799_v63 }
 0x239   : > { %869 = vrot.lane.b32.xlu0 %v732_v48, %s1987_s21 }
 0x23d   : > { %1138 = vrot.lane.b32.xlu0 %v732_v48, %s1988_s16 }
 0x2ac   : > { %v798_v1 = vpop.xlane.xlu0 %797 }
 0x2ad   : > { %v802_v2 = vsub.f32 %v793_v57, %v798_v1 }
 0x2af   : > { %v804_v3 = vmul.f32 1.442695, %v802_v2 }
 0x2b0   : > { %v801_v4 = vpop.xlane.xlu0 %800 }
 0x2b1   : > { %1854 = vpow2.f32 %v804_v3  ;;  %v803_v5 = vsub.f32 %v794_v61, %v801_v4 }
 0x2b3   : > { %v806_v6 = vmul.f32 1.442695, %v803_v5 }
 0x2b4   : > { %v870_v14 = vpop.permute.xlu0 %869 }
 0x2b5   : > { %1856 = vpow2.f32 %v806_v6  ;;  %v875_v23 = vsel %vm745_vm1, %v870_v14, 0 }
 0x2b8   : > { %v1139_v21 = vpop.permute.xlu0 %1138 }
 0x2b9   : > { %v1144_v25 = vsel %vm745_vm1, %v1139_v21, 0 }
 0x2bb   : > { %v1855_v7 = vpop.eup %1854 }
 0x2bc   : > { %v808_v8 = vsel %vm795_vm3, %v1855_v7, 0.0 }
 0x2bd   : > { %809 = vadd.xlane.f32.xlu1 %v808_v8 }
 0x2bf   : > { %v1857_v9 = vpop.eup %1856 }
 0x2c0   : > { %v811_v10 = vsel %vm795_vm3, %v1857_v9, 0.0 }
 0x2c1   : > { %812 = vadd.xlane.f32.xlu1 %v811_v10 }
 0x2d2   : > { %866 = vrot.lane.b32.xlu1 %v731_v52, %s1987_s21 }
 0x2d6   : > { %1004 = vrot.lane.b32.xlu1 %v732_v48, %s1989_s20 }
 0x2da   : > { %1002 = vrot.lane.b32.xlu1 %v731_v52, %s1989_s20 }
 0x2de   : > { %1136 = vrot.lane.b32.xlu1 %v731_v52, %s1988_s16 }
 0x34a   : > { %v810_v11 = vpop.xlane.xlu1 %809 }
 0x34b   : > { %1858 = vrcp.f32 %v810_v11 }
 0x34e   : > { %v813_v12 = vpop.xlane.xlu1 %812 }
 0x34f   : > { %1860 = vrcp.f32 %v813_v12 }
 0x352   : > { %v867_v13 = vpop.permute.xlu1 %866 }
 0x355   : > { %v1859_v16 = vpop.eup %1858 }
 0x356   : > { %v1005_v15 = vpop.permute.xlu1 %1004  ;;  %v816_v19 = vmul.f32 %v1859_v16, %v1855_v7 }
 0x357   : > { %v1010_v17 = vsel %vm745_vm1, %v1005_v15, 0 }
 0x358   : > { %1713 = vmatpush3.bf16.xpose.msra.mxu0 %v1010_v17 }
 0x359   : > { %v1861_v18 = vpop.eup %1860  ;;  %1724 = vmatprep.subr.bf16.mxu0 %v1984_v0 }
 0x35a   : > { %v817_v20 = vmul.f32 %v1861_v18, %v1857_v9  ;;  %v1003_v24 = vpop.permute.xlu1 %1002 }
 0x35c   : > { %v818_v22 = vpack.c.bf16 %v817_v20, %v816_v19 }
 0x35e   : > { %1697 = vmatmul.mubr.msk.bf16.vlgmr.msra.gmra.mrb[8].mxu1 %vm795_vm3, %v818_v22  ;;  %v1137_v27 = vpop.permute.xlu1 %1136 }
 0x35f   : > { %1701 = vmatpush3.bf16.xpose.msra.mxu1 %v875_v23  ;;  %1715 = vmatmul.mubr.msk.bf16.vlgmr.msra.gmra.mrb[4].mxu0 %vm745_vm1, %v1003_v24 }
 0x360   : > { %1725 = vmatpush3.bf16.xpose.msra.mxu0 %v1144_v25  ;;  %1702 = vmatprep.mubr.msk.bf16.mxu1 %vm1986_vm0, %v1984_v0 }
 0x361   : > { %1726 = vmatprep.mubr.msk.bf16.mxu0 %vm1986_vm0, %v1984_v0  ;;  %1706 = vmatprep.subr.bf16.mxu1 %v1984_v0 }
 0x362   : > { %1736 = vmatprep.subr.bf16.mxu0 %v1984_v0 }
 0x366   : > { %1703 = vmatmul.mubr.msk.bf16.vlgmr.msra.gmra.mrb[12].mxu1 %vm745_vm1, %v867_v13 }
 0x367   : > { %1727 = vmatmul.mubr.msk.bf16.vlgmr.msra.gmra.mrb[8].mxu0 %vm745_vm1, %v1137_v27  ;;  %1708 = vmatprep.mubr.msk.bf16.mxu1 %vm1986_vm0, %v1984_v0 }
 0x368   : > { %1752 = vmatprep.mubr.msk.bf16.mxu0 %vm1986_vm0, %v1984_v0 }
 0x431   : > { %v856_v28 = vpop.f32.mrb[8].mxu1 }
 0x432   : > { %863 = vst.msk [vmem:[#allocation2] sm:$0xff] %vm745_vm1, %v856_v28  ;;  %v1698_v30 = vpop.f32.mrb[9].mxu1  ;;  %v1046_v31 = vpop.f32.mrb[4].mxu0 }
 0x433   : > { %v859_v32 = vpop.f32.mrb[10].mxu1  ;;  %v1716_v33 = vpop.f32.mrb[5].mxu0  ;;  %v1053_v44 = vsel %vm743_vm2, %v1046_v31, -1e+09 }
 0x434   : > { %864 = vst.msk [vmem:[#allocation2 + $0x8] sm:$0xff] %vm745_vm1, %v859_v32  ;;  %v1699_v34 = vpop.f32.mrb[11].mxu1  ;;  %v1049_v35 = vpop.f32.mrb[6].mxu0  ;;  %v1055_v52 = vsel %vm795_vm3, %v1053_v44, -inf }
 0x435   : > { %v1717_v36 = vpop.f32.mrb[7].mxu0  ;;  %v1054_v53 = vsel %vm744_vm4, %v1049_v35, -1e+09 }
 0x436   : > { %v1058_v57 = vsel %vm795_vm3, %v1054_v53, -inf }
 0x439   : > { %v911_v37 = vpop.f32.mrb[12].mxu1 }
 0x43a   : > { %v918_v38 = vsel %vm743_vm2, %v911_v37, -1e+09  ;;  %v1704_v39 = vpop.f32.mrb[13].mxu1  ;;  %v1180_v40 = vpop.f32.mrb[8].mxu0 }
 0x43b   : > { %v914_v41 = vpop.f32.mrb[14].mxu1  ;;  %v1728_v42 = vpop.f32.mrb[9].mxu0  ;;  %v920_v43 = vsel %vm795_vm3, %v918_v38, -inf  ;;  %v1187_v58 = vsel %vm743_vm2, %v1180_v40, -1e+09 }
 0x43c   : > { %v919_v45 = vsel %vm744_vm4, %v914_v41, -1e+09  ;;  %921 = vmax.xlane.f32.xlu0 %v920_v43  ;;  %v1705_v46 = vpop.f32.mrb[15].mxu1  ;;  %v1183_v47 = vpop.f32.mrb[10].mxu0  ;;  %v1189_v59 = vsel %vm795_vm3, %v1187_v58, -inf }
 0x43d   : > { %v1729_v48 = vpop.f32.mrb[11].mxu0  ;;  %v923_v49 = vsel %vm795_vm3, %v919_v45, -inf  ;;  %v1188_v50 = vsel %vm744_vm4, %v1183_v47, -1e+09 }
 0x43e   : > { %924 = vmax.xlane.f32.xlu1 %v923_v49  ;;  %v1192_v56 = vsel %vm795_vm3, %v1188_v50, -inf  ;;  %v1845_v49 = vld [vmem:[#allocation5] sm:$0xff]  }
 0x43f   : > { %1737 = vmatpush3.bf16.msra.mxu0 %v1845_v49 }
 0x440   : > { %1056 = vmax.xlane.f32.xlu0 %v1055_v52  ;;  %1738 = vmatprep.subr.bf16.mxu0 %v1984_v0  ;;  %v1847_v52 = vld [vmem:[#allocation5 + $0x10] sm:$0xff]  }
 0x442   : > { %1193 = vmax.xlane.f32.xlu1 %v1192_v56  ;;  %v1849_v56 = vld [vmem:[#allocation5 + $0x20] sm:$0xff]  }
 0x444   : > { %1059 = vmax.xlane.f32.xlu0 %v1058_v57 }
 0x448   : > { %1190 = vmax.xlane.f32.xlu0 %v1189_v59 }
 0x4c9   : > { %v922_v60 = vpop.xlane.xlu0 %921 }
 0x4ca   : > { %v926_v5 = vsub.f32 %v918_v38, %v922_v60 }
 0x4cb   : > { %v925_v61 = vpop.xlane.xlu1 %924 }
 0x4cc   : > { %v927_v6 = vsub.f32 %v919_v45, %v925_v61  ;;  %v928_v9 = vmul.f32 1.442695, %v926_v5  ;;  %v1850_v61 = vld [vmem:[#allocation5 + $0x28] sm:$0xff]  }
 0x4cd   : > { %v1057_v62 = vpop.xlane.xlu0 %1056 }
 0x4ce   : > { %v1061_v63 = vsub.f32 %v1053_v44, %v1057_v62  ;;  %v930_v10 = vmul.f32 1.442695, %v927_v6  ;;  %v1851_v62 = vld [vmem:[#allocation5 + $0x30] sm:$0xff]  }
 0x4cf   : > { %v1194_v55 = vpop.xlane.xlu1 %1193 }
 0x4d0   : > { %v1063_v1 = vmul.f32 1.442695, %v1061_v63  ;;  %v1196_v2 = vsub.f32 %v1188_v50, %v1194_v55  ;;  %v1846_v50 = vld [vmem:[#allocation5 + $0x8] sm:$0xff]  }
 0x4d1   : > { %v1060_v3 = vpop.xlane.xlu0 %1059  ;;  %1739 = vmatpush3.bf16.msra.mxu0 %v1846_v50 }
 0x4d2   : > { %1862 = vpow2.f32 %v1063_v1  ;;  %v1062_v4 = vsub.f32 %v1054_v53, %v1060_v3  ;;  %v1199_v7 = vmul.f32 1.442695, %v1196_v2  ;;  %1740 = vmatprep.subr.bf16.mxu0 %v1984_v0  ;;  %v1848_v53 = vld [vmem:[#allocation5 + $0x18] sm:$0xff]  }
 0x4d3   : > { %v1852_v2 = vld [vmem:[#allocation5 + $0x38] sm:$0xff]  }
 0x4d4   : > { %v1065_v8 = vmul.f32 1.442695, %v1062_v4 }
 0x4d5   : > { %v1191_v29 = vpop.xlane.xlu0 %1190  ;;  %1741 = vmatpush3.bf16.msra.mxu0 %v1847_v52 }
 0x4d6   : > { %1864 = vpow2.f32 %v1065_v8  ;;  %v1195_v54 = vsub.f32 %v1187_v58, %v1191_v29  ;;  %1742 = vmatprep.subr.bf16.mxu0 %v1984_v0 }
 0x4d7   : > { %1866 = vpow2.f32 %v1199_v7 }
 0x4d8   : > { %v1197_v11 = vmul.f32 1.442695, %v1195_v54 }
 0x4d9   : > { %1743 = vmatpush3.bf16.msra.mxu0 %v1848_v53 }
 0x4da   : > { %1868 = vpow2.f32 %v1197_v11  ;;  %1744 = vmatprep.subr.bf16.mxu0 %v1984_v0 }
 0x4db   : > { %1870 = vpow2.f32 %v928_v9 }
 0x4dc   : > { %v1863_v12 = vpop.eup %1862  ;;  %1872 = vpow2.f32 %v930_v10 }
 0x4dd   : > { %v1067_v13 = vsel %vm795_vm3, %v1863_v12, 0.0  ;;  %1745 = vmatpush3.bf16.msra.mxu0 %v1849_v56 }
 0x4de   : > { %1068 = vadd.xlane.f32.xlu0 %v1067_v13  ;;  %1746 = vmatprep.subr.bf16.mxu0 %v1984_v0 }
 0x4e0   : > { %v1865_v14 = vpop.eup %1864 }
 0x4e1   : > { %v1070_v15 = vsel %vm795_vm3, %v1865_v14, 0.0  ;;  %v1867_v16 = vpop.eup %1866  ;;  %1747 = vmatpush3.bf16.msra.mxu0 %v1850_v61 }
 0x4e2   : > { %1071 = vadd.xlane.f32.xlu1 %v1070_v15  ;;  %v1204_v20 = vsel %vm795_vm3, %v1867_v16, 0.0  ;;  %1748 = vmatprep.subr.bf16.mxu0 %v1984_v0  ;;  %v452_v15 = vunpack.c.l.bf16 %v2186_v26 }
 0x4e4   : > { %v1869_v17 = vpop.eup %1868 }
 0x4e5   : > { %v1871_v18 = vpop.eup %1870  ;;  %v1201_v19 = vsel %vm795_vm3, %v1869_v17, 0.0  ;;  %1749 = vmatpush3.bf16.msra.mxu0 %v1851_v62 }
 0x4e6   : > { %v1873_v21 = vpop.eup %1872  ;;  %1202 = vadd.xlane.f32.xlu0 %v1201_v19  ;;  %1205 = vadd.xlane.f32.xlu1 %v1204_v20  ;;  %v932_v22 = vsel %vm795_vm3, %v1871_v18, 0.0  ;;  %v453_v19 = vunpack.c.h.bf16 %v2186_v26 }
 0x4e7   : > { %v935_v23 = vsel %vm795_vm3, %v1873_v21, 0.0  ;;  %1750 = vmatprep.subr.bf16.mxu0 %v1984_v0 }
 0x4e9   : > { %1751 = vmatpush3.bf16.msra.mxu0 %v1852_v2 }
 0x4ea   : > { %933 = vadd.xlane.f32.xlu0 %v932_v22  ;;  %936 = vadd.xlane.f32.xlu1 %v935_v23 }
 0x4fb   : > { %1078 = vrot.lane.b32.xlu1 %v2206_v51, %s1989_s20 }
 0x4ff   : > { %1212 = vrot.lane.b32.xlu1 %v2206_v51, %s1988_s16 }
 0x500   : > { %944 = vrot.lane.b32.xlu0 %v2206_v51, %s1987_s21 }
 0x56b   : > { %v1069_v24 = vpop.xlane.xlu0 %1068 }
 0x56f   : > { %v1072_v25 = vpop.xlane.xlu1 %1071 }
 0x573   : > { %v1203_v27 = vpop.xlane.xlu0 %1202  ;;  %v1206_v28 = vpop.xlane.xlu1 %1205 }
 0x577   : > { %v934_v30 = vpop.xlane.xlu0 %933  ;;  %v937_v31 = vpop.xlane.xlu1 %936 }
 0x578   : > { %1874 = vrcp.f32 %v934_v30 }
 0x579   : > { %1876 = vrcp.f32 %v937_v31 }
 0x57a   : > { %1878 = vrcp.f32 %v1072_v25 }
 0x57b   : > { %v945_v32 = vpop.permute.xlu0 %944  ;;  %1880 = vrcp.f32 %v1069_v24  ;;  %v1079_v38 = vpop.permute.xlu1 %1078 }
 0x57c   : > { %1707 = vmatpush3.bf16.msra.mxu1 %v945_v32  ;;  %1882 = vrcp.f32 %v1203_v27 }
 0x57d   : > { %1718 = vmatprep.subr.bf16.mxu1 %v1984_v0  ;;  %1884 = vrcp.f32 %v1206_v28 }
 0x57f   : > { %v1213_v45 = vpop.permute.xlu1 %1212 }
 0x582   : > { %v1875_v33 = vpop.eup %1874 }
 0x583   : > { %v1877_v34 = vpop.eup %1876  ;;  %v940_v35 = vmul.f32 %v1875_v33, %v1871_v18 }
 0x584   : > { %v941_v36 = vmul.f32 %v1877_v34, %v1873_v21  ;;  %v1879_v37 = vpop.eup %1878 }
 0x585   : > { %v1881_v39 = vpop.eup %1880  ;;  %v1076_v40 = vmul.f32 %v1879_v37, %v1865_v14  ;;  %v1609_v14 = vld [vmem:[%s2349_s7] ss:$0 sm:$0xff] }
 0x586   : > { %v942_v51 = vpack.c.bf16 %v941_v36, %v940_v35  ;;  %v1075_v41 = vmul.f32 %v1881_v39, %v1863_v12  ;;  %v1883_v42 = vpop.eup %1882 }
 0x587   : > { %v1885_v44 = vpop.eup %1884  ;;  %v1209_v46 = vmul.f32 %v1883_v42, %v1869_v17 }
 0x588   : > { %1709 = vmatmul.mubr.msk.bf16.vlgmr.msra.gmra.mrb[16].mxu1 %vm795_vm3, %v942_v51  ;;  %v1077_v43 = vpack.c.bf16 %v1076_v40, %v1075_v41  ;;  %v1210_v47 = vmul.f32 %v1885_v44, %v1867_v16  ;;  %v1618_v41 = vld [vmem:[%s2350_s8] ss:$0 sm:$0xff] }
 0x589   : > { %1719 = vmatpush3.bf16.msra.mxu1 %v1079_v38  ;;  %1720 = vmatprep.mubr.msk.bf16.mxu1 %vm1986_vm0, %v1984_v0 }
 0x58a   : > { %1730 = vmatprep.subr.bf16.mxu1 %v1984_v0  ;;  %v1211_v48 = vpack.c.bf16 %v1210_v47, %v1209_v46 }
 0x590   : > { %1721 = vmatmul.mubr.msk.bf16.vlgmr.msra.gmra.mrb[20].mxu1 %vm795_vm3, %v1077_v43 }
 0x591   : > { %1731 = vmatpush3.bf16.msra.mxu1 %v1213_v45  ;;  %1732 = vmatprep.mubr.msk.bf16.mxu1 %vm1986_vm0, %v1984_v0  ;;  %v1619_v45 = vld [vmem:[%s2351_s9] ss:$0 sm:$0xff] }
 0x598   : > { %1733 = vmatmul.mubr.msk.bf16.vlgmr.msra.gmra.mrb[24].mxu1 %vm795_vm3, %v1211_v48 }
 0x65b   : > { %v984_v57 = vpop.f32.mrb[16].mxu1 }
 0x65c   : > { %993 = vrot.lane.b32.xlu1 %v984_v57, %s1988_s16  ;;  %v1710_v58 = vpop.f32.mrb[17].mxu1 }
 0x65d   : > { %v987_v59 = vpop.f32.mrb[18].mxu1 }
 0x65e   : > { %995 = vrot.lane.b32.xlu0 %v987_v59, %s1988_s16  ;;  %v1711_v60 = vpop.f32.mrb[19].mxu1 }
 0x663   : > { %v1118_v63 = vpop.f32.mrb[20].mxu1 }
 0x664   : > { %1127 = vrot.lane.b32.xlu1 %v1118_v63, %s1989_s20  ;;  %v1722_v55 = vpop.f32.mrb[21].mxu1 }
 0x665   : > { %v1121_v1 = vpop.f32.mrb[22].mxu1 }
 0x666   : > { %1129 = vrot.lane.b32.xlu0 %v1121_v1, %s1989_s20  ;;  %v1723_v3 = vpop.f32.mrb[23].mxu1 }
 0x66b   : > { %v1252_v4 = vpop.f32.mrb[24].mxu1 }
 0x66c   : > { %1261 = vrot.lane.b32.xlu1 %v1252_v4, %s1987_s21  ;;  %v1734_v5 = vpop.f32.mrb[25].mxu1 }
 0x66d   : > { %v1255_v6 = vpop.f32.mrb[26].mxu1 }
 0x66e   : > { %1263 = vrot.lane.b32.xlu0 %v1255_v6, %s1987_s21  ;;  %v1735_v7 = vpop.f32.mrb[27].mxu1 }
 0x6ce   : > { %v994_v8 = vpop.permute.xlu1 %993 }
 0x6cf   : > { %1000 = vst.msk [vmem:[#allocation2] sm:$0xff] %vm999_vm5, %v994_v8 }
 0x6d0   : > { %v996_v29 = vpop.permute.xlu0 %995 }
 0x6d1   : > { %1001 = vst.msk [vmem:[#allocation2 + $0x8] sm:$0xff] %vm999_vm5, %v996_v29 }
 0x6d6   : > { %v1128_v54 = vpop.permute.xlu1 %1127 }
 0x6d7   : > { %1134 = vst.msk [vmem:[#allocation2] sm:$0xff] %vm1133_vm6, %v1128_v54 }
 0x6d8   : > { %v1130_v9 = vpop.permute.xlu0 %1129 }
 0x6d9   : > { %1135 = vst.msk [vmem:[#allocation2 + $0x8] sm:$0xff] %vm1133_vm6, %v1130_v9 }
 0x6de   : > { %v1262_v0 = vpop.permute.xlu1 %1261 }
 0x6df   : > { %1268 = vst.msk [vmem:[#allocation2] sm:$0xff] %vm1267_vm7, %v1262_v0 }
 0x6e0   : > { %v1264_v10 = vpop.permute.xlu0 %1263 }
 0x6e1   : > { %1269 = vst.msk [vmem:[#allocation2 + $0x8] sm:$0xff] %vm1267_vm7, %v1264_v10 }
 0x6e6   : > { %v1270_v11 = vld [vmem:[#allocation2] sm:$0xff] }
 0x6e8   : > { %v1271_v12 = vld [vmem:[#allocation2 + $0x8] sm:$0xff] }
 0x6e9   : > { %v1272_v13 = vpack.c.bf16 %v1271_v12, %v1270_v11 }
 0x6eb   : > { %1753 = vmatmul.mubr.bf16.vlgmr.msra.gmra.mrb[12].mxu0 %v1272_v13 }
 0x7be   : > { %v1378_v16 = vpop.f32.mrb[12].mxu0 }
 0x7bf   : > { %v1379_v17 = vadd.f32 %v1609_v14, %v1378_v16  ;;  %v1754_v18 = vpop.f32.mrb[13].mxu0 }
 0x7c0   : > { %v1381_v20 = vpop.f32.mrb[14].mxu0 }
 0x7c1   : > { %v1382_v21 = vadd.f32 %v1609_v14, %v1381_v20  ;;  %v1755_v22 = vpop.f32.mrb[15].mxu0  ;;  %v1385_v23 = vadd.f32 %v1379_v17, %v452_v15 }
 0x7c3   : > { %1389 = vadd.xlane.f32.xlu1 %v1385_v23  ;;  %v1386_v24 = vadd.f32 %v1382_v21, %v453_v19 }
 0x7c5   : > { %1391 = vadd.xlane.f32.xlu0 %v1386_v24 }
 0x850   : > { %v1390_v25 = vpop.xlane.xlu1 %1389 }
 0x851   : > { %v1394_v27 = vmul.f32 0.0078125, %v1390_v25 }
 0x852   : > { %v1392_v28 = vpop.xlane.xlu0 %1391 }
 0x853   : > { %v1396_v30 = vsub.f32 %v1385_v23, %v1394_v27  ;;  %v1395_v31 = vmul.f32 0.0078125, %v1392_v28 }
 0x855   : > { %v1397_v32 = vsub.f32 %v1386_v24, %v1395_v31  ;;  %v1398_v33 = vmul.f32 %v1396_v30, %v1396_v30 }
 0x857   : > { %1400 = vadd.xlane.f32.xlu0 %v1398_v33  ;;  %v1399_v34 = vmul.f32 %v1397_v32, %v1397_v32 }
 0x85b   : > { %1402 = vadd.xlane.f32.xlu0 %v1399_v34 }
 0x8e4   : > { %v1401_v35 = vpop.xlane.xlu0 %1400 }
 0x8e5   : > { %v1404_v36 = vmul.f32 0.0078125, %v1401_v35 }
 0x8e7   : > { %v1406_v26 = vadd.f32 1e-06, %v1404_v36 }
 0x8e8   : > { %v1403_v51 = vpop.xlane.xlu0 %1402 }
 0x8e9   : > { %1886 = vrsqrt.f32 %v1406_v26  ;;  %v1405_v37 = vmul.f32 0.0078125, %v1403_v51 }
 0x8eb   : > { %v1407_v38 = vadd.f32 1e-06, %v1405_v37 }
 0x8ed   : > { %1888 = vrsqrt.f32 %v1407_v38 }
 0x8f3   : > { %v1887_v39 = vpop.eup %1886 }
 0x8f4   : > { %v1410_v40 = vmul.f32 %v1887_v39, %v1396_v30 }
 0x8f6   : > { %v1418_v43 = vmul.f32 %v1618_v41, %v1410_v40 }
 0x8f7   : > { %v1889_v42 = vpop.eup %1888 }
 0x8f8   : > { %v1411_v44 = vmul.f32 %v1889_v42, %v1397_v32  ;;  %v1426_v47 = vadd.f32 %v1619_v45, %v1418_v43 }
 0x8fa   : > { %v1419_v46 = vmul.f32 %v1618_v41, %v1411_v44 }
 0x8fc   : > { %v1427_v48 = vadd.f32 %v1619_v45, %v1419_v46 }
 0x8fe   : > { %v1632_v49 = vpack.c.bf16 %v1427_v48, %v1426_v47 }
 0x900   : > { %1633 = vst [vmem:[%s447_s27] sm:$0xff] %v1632_v49  }
 0x901 PF: > { %s22_s15 = sadd.s32 1, %s1976_s15   ;;  %s2361_s13 = smov %s1972_s14 }
 0x902   : > { %p19_p3 = scmp.ge.s32.totalorder %s22_s15, 4   ;;  %s2362_s14 = smov %s2364_s17 }
 0x904   :  { %21 = sbr.rel (!%p19_p3) target bundleno = 3 (0x3), region = 102 }
 0x90b   :  { %1468 = vsyncpa [#allocation4], 1 }
 0x90c   :  { %1470 = vsyncpa [#allocation4 + $0x1], 1 }
 0x90d   :  { %1471 = vsyncpa [#allocation6], 1 }

</bundles_post_ra>
